<compile_context>
chip_gen: v6e
topology: v6e:2x2x1
jax: 0.10.0
libtpu: 0.0.40
codegen_flags: <defaults>
</compile_context>

<pallas_src>
import jax
import jax.numpy as jnp
from jax import lax
from jax.experimental import pallas as pl
from jax.experimental.pallas import tpu as pltpu


def _pick_band_rows(h_out, w_pad, c_out, batch):
    """Output rows computed per grid step.

    Must divide h_out and be either == h_out or a multiple of 8 so the output
    BlockSpec satisfies the (8, 128) tiling rule.  Largest candidate whose f32
    wide accumulator fits an ~8 MiB budget (comfortable under v7x's 64 MiB
    VMEM once double-buffered I/O blocks are added).
    """
    budget = 8 << 20

    def ok(th):
        return (th == h_out or th % 8 == 0) and c_out * th * w_pad * 4 <= budget

    cands = [t for t in range(h_out, 0, -1) if h_out % t == 0 and ok(t)]
    if not cands:
        return h_out
    th = cands[0]
    if batch == 1 and th == h_out:
        # Single image: prefer >=2 grid steps so both v7x TensorCores get work.
        smaller = [t for t in cands if t < h_out]
        if smaller:
            th = smaller[0]
    return th


def basic_conv2d(x, weight, bn_gamma, bn_beta, bn_mean, bn_var,
                 *, stride=1, padding=0, dilation=1, eps=1e-5):
    """relu(batchnorm(conv2d(x, weight))), inference-mode BN.

    x: (N, C_in, H, W) NCHW; weight: (C_out, C_in, kh, kw).  Returns NCHW f32.
    """
    if stride != 1:
        # TODO(synk): stride > 1 needs strided in-VMEM tap slicing (or an
        # im2col fallback); only the stride == 1 path is implemented here.
        raise NotImplementedError("basic_conv2d Pallas kernel: stride must be 1")

    n, c_in, h, w = x.shape
    c_out, _, kh, kw = weight.shape
    d = dilation
    hp, wp = h + 2 * padding, w + 2 * padding
    h_out = hp - d * (kh - 1)
    w_out = wp - d * (kw - 1)

    # ---- host-side prep: bf16 first, pad, flatten spatial; no transposes ----
    # Tail of d*(kw-1) zeros so the widest tap read never runs past the buffer.
    tail = d * (kw - 1)
    xp = jnp.pad(x.astype(jnp.bfloat16),
                 ((0, 0), (0, 0), (padding, padding), (padding, padding)))
    xf = jnp.pad(xp.reshape(n, c_in, hp * wp), ((0, 0), (0, 0), (0, tail)))
    lp = hp * wp + tail

    # (C_out, C_in, kh, kw) -> (kh*kw, C_out, C_in) bf16 MXU operand.
    w_taps = jnp.transpose(weight, (2, 3, 0, 1)).reshape(kh * kw, c_out, c_in)
    w_taps = w_taps.astype(jnp.bfloat16)

    # Inference BatchNorm kept in f32 and applied in the epilogue (keeps full
    # precision even when bn_var is tiny).
    scale = (bn_gamma / jnp.sqrt(bn_var + eps)).astype(jnp.float32)
    bias = bn_beta.astype(jnp.float32) - bn_mean.astype(jnp.float32) * scale
    scale = scale.reshape(c_out, 1)
    bias = bias.reshape(c_out, 1)

    th = _pick_band_rows(h_out, wp, c_out, n)
    n_bands = h_out // th
    taps = [(i, j) for i in range(kh) for j in range(kw)]

    def kernel(x_ref, w_ref, s_ref, b_ref, o_ref, y_ref):
        # x_ref: (c_in, lp)            bf16  padded image, spatial flattened
        # w_ref: (kh*kw, c_out, c_in)  bf16  per-tap weights (transposed)
        # s_ref, b_ref: (c_out, 1)     f32   BN scale / bias
        # o_ref: (c_out, th, w_out)    f32   output band (lane-dense spatial)
        # y_ref: (c_out, th*wp)        f32   scratch: wide band incl. junk cols
        row0 = pl.program_id(1) * th if n_bands > 1 else 0
        acc = jnp.zeros((c_out, th * wp), jnp.float32)
        for t, (i, j) in enumerate(taps):
            start = (row0 + i * d) * wp + j * d
            patch = x_ref[:, pl.ds(start, th * wp)]            # (c_in, th*wp)
            acc = acc + jnp.dot(w_ref[t], patch,
                                preferred_element_type=jnp.float32)
        y_ref[...] = jnp.maximum(acc * s_ref[...] + b_ref[...], 0.0)
        # Keep only the w_out valid columns of every output row.
        # TODO(synk): for very large bands use a fori_loop instead of unrolling.
        for r in range(th):
            o_ref[:, r, :] = y_ref[:, pl.ds(r * wp, w_out)]

    # VMEM estimate (double-buffered blocks + scratch); raise-only vs defaults.
    est = (2 * c_in * lp * 2
           + 2 * kh * kw * c_out * c_in * 2
           + 4 * c_out * 4
           + 2 * c_out * th * w_out * 4
           + c_out * th * wp * 4)
    vmem_limit = int(min(max(2 * est, 32 << 20), 64 << 20))

    out = pl.pallas_call(
        kernel,
        out_shape=jax.ShapeDtypeStruct((n, c_out, h_out, w_out), jnp.float32),
        grid_spec=pltpu.PrefetchScalarGridSpec(
            num_scalar_prefetch=0,
            grid=(n, n_bands),
            in_specs=[
                pl.BlockSpec((None, c_in, lp), lambda b, t: (b, 0, 0)),
                pl.BlockSpec((kh * kw, c_out, c_in), lambda b, t: (0, 0, 0)),
                pl.BlockSpec((c_out, 1), lambda b, t: (0, 0)),
                pl.BlockSpec((c_out, 1), lambda b, t: (0, 0)),
            ],
            out_specs=pl.BlockSpec((None, c_out, th, w_out),
                                   lambda b, t: (b, 0, t, 0)),
            scratch_shapes=[pltpu.VMEM((c_out, th * wp), jnp.float32)],
        ),
        compiler_params=pltpu.CompilerParams(
            dimension_semantics=("parallel", "parallel"),
            vmem_limit_bytes=vmem_limit),
    )(xf, w_taps, scale, bias)
    return out


def _reference(x, weight, gamma, beta, mean, var, *, stride, padding,
               dilation, eps=1e-5):
    y = lax.conv_general_dilated(
        x, weight, window_strides=(stride, stride),
        padding=[(padding, padding), (padding, padding)],
        rhs_dilation=(dilation, dilation),
        dimension_numbers=("NCHW", "OIHW", "NCHW"))
    s = (gamma / jnp.sqrt(var + eps)).reshape(1, -1, 1, 1)
    b = (beta - mean * gamma / jnp.sqrt(var + eps)).reshape(1, -1, 1, 1)
    return jnp.maximum(y * s + b, 0.0)


if __name__ == "__main__":
    # BasicConv2d(in_planes=4, out_planes=8, kernel_size=3, stride=1, padding=1)
    N, C_in, HW = 2, 4, 16
    C_out, ksize, stride, padding, dilation = 8, 3, 1, 1, 1

    key = jax.random.PRNGKey(0)
    kx, kw_, kg, kb, km, kv = jax.random.split(key, 6)

    x = jax.random.normal(kx, (N, C_in, HW, HW), dtype=jnp.float32)
    weight = 0.1 * jax.random.normal(kw_, (C_out, C_in, ksize, ksize),
                                     dtype=jnp.float32)
    # BatchNorm2d parameters / running statistics (inference mode).
    # TODO(synk): training-mode BN (batch stats + running-stat update) is not
    # implemented; eval-mode semantics are used (matches module.eval()).
    bn_gamma = 1.0 + 0.1 * jax.random.normal(kg, (C_out,), dtype=jnp.float32)
    bn_beta = 0.1 * jax.random.normal(kb, (C_out,), dtype=jnp.float32)
    bn_mean = 0.1 * jax.random.normal(km, (C_out,), dtype=jnp.float32)
    bn_var = jnp.abs(1.0 + 0.1 * jax.random.normal(kv, (C_out,),
                                                   dtype=jnp.float32))

    out = basic_conv2d(x, weight, bn_gamma, bn_beta, bn_mean, bn_var,
                       stride=stride, padding=padding, dilation=dilation)
    out = jax.block_until_ready(out)

    ref = _reference(x, weight, bn_gamma, bn_beta, bn_mean, bn_var,
                     stride=stride, padding=padding, dilation=dilation)
    assert out.shape == (N, C_out, HW, HW), out.shape
    # bf16 MXU operands (f32 accumulate / f32 BN epilogue) -> loosened tolerance.
    assert jnp.allclose(out, ref, atol=3e-2, rtol=3e-2), \
        float(jnp.max(jnp.abs(out - ref)))

    print("KERNEL_OK")
</pallas_src>

<mosaic_0001>
module attributes {stable_mosaic.version = 11 : i64} {
  func.func @kernel(%arg0: i32, %arg1: i32, %arg2: memref<1x4x326xbf16, #tpu.memory_space<vmem>>, %arg3: memref<9x8x4xbf16, #tpu.memory_space<vmem>>, %arg4: memref<8x1xf32, #tpu.memory_space<vmem>>, %arg5: memref<8x1xf32, #tpu.memory_space<vmem>>, %arg6: memref<1x8x16x16xf32, #tpu.memory_space<vmem>>, %arg7: memref<8x288xf32, #tpu.memory_space<vmem>>) attributes {dimension_semantics = [#tpu.dimension_semantics<parallel>, #tpu.dimension_semantics<parallel>], iteration_bounds = array<i64: 2, 1>, scalar_prefetch = 0 : i64, scratch_operands = 1 : i64, tpu.core_type = #tpu.core_type<tc>, window_params = [{transform_indices = @transform_0, window_bounds = array<i64: 1, 4, 326>}, {pipeline_mode = #tpu.pipeline_mode<synchronous>, transform_indices = @transform_1, window_bounds = array<i64: 9, 8, 4>}, {pipeline_mode = #tpu.pipeline_mode<synchronous>, transform_indices = @transform_2, window_bounds = array<i64: 8, 1>}, {pipeline_mode = #tpu.pipeline_mode<synchronous>, transform_indices = @transform_3, window_bounds = array<i64: 8, 1>}, {transform_indices = @transform_4, window_bounds = array<i64: 1, 8, 16, 16>}]} {
    %cst = arith.constant 0.000000e+00 : f32
    %0 = vector.broadcast %cst : f32 to vector<8x288xf32>
    %c0 = arith.constant 0 : index
    %c0_0 = arith.constant 0 : index
    %c0_1 = arith.constant 0 : index
    %1 = vector.load %arg2[%c0, %c0_0, %c0_1] : memref<1x4x326xbf16, #tpu.memory_space<vmem>>, vector<1x4x288xbf16>
    %2 = vector.shape_cast %1 : vector<1x4x288xbf16> to vector<4x288xbf16>
    %c0_2 = arith.constant 0 : index
    %c0_3 = arith.constant 0 : index
    %c0_4 = arith.constant 0 : index
    %3 = vector.load %arg3[%c0_2, %c0_3, %c0_4] : memref<9x8x4xbf16, #tpu.memory_space<vmem>>, vector<1x8x4xbf16>
    %4 = vector.shape_cast %3 : vector<1x8x4xbf16> to vector<8x4xbf16>
    %cst_5 = arith.constant dense<0.000000e+00> : vector<8x288xf32>
    %5 = tpu.matmul %4, %2, %cst_5 {dimension_numbers = #tpu.dot_dimension_numbers<[1], [0], [0], [1], [0, 0, 1, 1], [], []>} : vector<8x4xbf16>, vector<4x288xbf16>, vector<8x288xf32> -> vector<8x288xf32>
    %6 = arith.addf %0, %5 : vector<8x288xf32>
    %c0_6 = arith.constant 0 : index
    %c0_7 = arith.constant 0 : index
    %c1 = arith.constant 1 : index
    %7 = vector.load %arg2[%c0_6, %c0_7, %c1] : memref<1x4x326xbf16, #tpu.memory_space<vmem>>, vector<1x4x288xbf16>
    %8 = vector.shape_cast %7 : vector<1x4x288xbf16> to vector<4x288xbf16>
    %c1_8 = arith.constant 1 : index
    %c0_9 = arith.constant 0 : index
    %c0_10 = arith.constant 0 : index
    %9 = vector.load %arg3[%c1_8, %c0_9, %c0_10] : memref<9x8x4xbf16, #tpu.memory_space<vmem>>, vector<1x8x4xbf16>
    %10 = vector.shape_cast %9 : vector<1x8x4xbf16> to vector<8x4xbf16>
    %cst_11 = arith.constant dense<0.000000e+00> : vector<8x288xf32>
    %11 = tpu.matmul %10, %8, %cst_11 {dimension_numbers = #tpu.dot_dimension_numbers<[1], [0], [0], [1], [0, 0, 1, 1], [], []>} : vector<8x4xbf16>, vector<4x288xbf16>, vector<8x288xf32> -> vector<8x288xf32>
    %12 = arith.addf %6, %11 : vector<8x288xf32>
    %c0_12 = arith.constant 0 : index
    %c0_13 = arith.constant 0 : index
    %c2 = arith.constant 2 : index
    %13 = vector.load %arg2[%c0_12, %c0_13, %c2] : memref<1x4x326xbf16, #tpu.memory_space<vmem>>, vector<1x4x288xbf16>
    %14 = vector.shape_cast %13 : vector<1x4x288xbf16> to vector<4x288xbf16>
    %c2_14 = arith.constant 2 : index
    %c0_15 = arith.constant 0 : index
    %c0_16 = arith.constant 0 : index
    %15 = vector.load %arg3[%c2_14, %c0_15, %c0_16] : memref<9x8x4xbf16, #tpu.memory_space<vmem>>, vector<1x8x4xbf16>
    %16 = vector.shape_cast %15 : vector<1x8x4xbf16> to vector<8x4xbf16>
    %cst_17 = arith.constant dense<0.000000e+00> : vector<8x288xf32>
    %17 = tpu.matmul %16, %14, %cst_17 {dimension_numbers = #tpu.dot_dimension_numbers<[1], [0], [0], [1], [0, 0, 1, 1], [], []>} : vector<8x4xbf16>, vector<4x288xbf16>, vector<8x288xf32> -> vector<8x288xf32>
    %18 = arith.addf %12, %17 : vector<8x288xf32>
    %c0_18 = arith.constant 0 : index
    %c0_19 = arith.constant 0 : index
    %c18 = arith.constant 18 : index
    %19 = vector.load %arg2[%c0_18, %c0_19, %c18] : memref<1x4x326xbf16, #tpu.memory_space<vmem>>, vector<1x4x288xbf16>
    %20 = vector.shape_cast %19 : vector<1x4x288xbf16> to vector<4x288xbf16>
    %c3 = arith.constant 3 : index
    %c0_20 = arith.constant 0 : index
    %c0_21 = arith.constant 0 : index
    %21 = vector.load %arg3[%c3, %c0_20, %c0_21] : memref<9x8x4xbf16, #tpu.memory_space<vmem>>, vector<1x8x4xbf16>
    %22 = vector.shape_cast %21 : vector<1x8x4xbf16> to vector<8x4xbf16>
    %cst_22 = arith.constant dense<0.000000e+00> : vector<8x288xf32>
    %23 = tpu.matmul %22, %20, %cst_22 {dimension_numbers = #tpu.dot_dimension_numbers<[1], [0], [0], [1], [0, 0, 1, 1], [], []>} : vector<8x4xbf16>, vector<4x288xbf16>, vector<8x288xf32> -> vector<8x288xf32>
    %24 = arith.addf %18, %23 : vector<8x288xf32>
    %c0_23 = arith.constant 0 : index
    %c0_24 = arith.constant 0 : index
    %c19 = arith.constant 19 : index
    %25 = vector.load %arg2[%c0_23, %c0_24, %c19] : memref<1x4x326xbf16, #tpu.memory_space<vmem>>, vector<1x4x288xbf16>
    %26 = vector.shape_cast %25 : vector<1x4x288xbf16> to vector<4x288xbf16>
    %c4 = arith.constant 4 : index
    %c0_25 = arith.constant 0 : index
    %c0_26 = arith.constant 0 : index
    %27 = vector.load %arg3[%c4, %c0_25, %c0_26] : memref<9x8x4xbf16, #tpu.memory_space<vmem>>, vector<1x8x4xbf16>
    %28 = vector.shape_cast %27 : vector<1x8x4xbf16> to vector<8x4xbf16>
    %cst_27 = arith.constant dense<0.000000e+00> : vector<8x288xf32>
    %29 = tpu.matmul %28, %26, %cst_27 {dimension_numbers = #tpu.dot_dimension_numbers<[1], [0], [0], [1], [0, 0, 1, 1], [], []>} : vector<8x4xbf16>, vector<4x288xbf16>, vector<8x288xf32> -> vector<8x288xf32>
    %30 = arith.addf %24, %29 : vector<8x288xf32>
    %c0_28 = arith.constant 0 : index
    %c0_29 = arith.constant 0 : index
    %c20 = arith.constant 20 : index
    %31 = vector.load %arg2[%c0_28, %c0_29, %c20] : memref<1x4x326xbf16, #tpu.memory_space<vmem>>, vector<1x4x288xbf16>
    %32 = vector.shape_cast %31 : vector<1x4x288xbf16> to vector<4x288xbf16>
    %c5 = arith.constant 5 : index
    %c0_30 = arith.constant 0 : index
    %c0_31 = arith.constant 0 : index
    %33 = vector.load %arg3[%c5, %c0_30, %c0_31] : memref<9x8x4xbf16, #tpu.memory_space<vmem>>, vector<1x8x4xbf16>
    %34 = vector.shape_cast %33 : vector<1x8x4xbf16> to vector<8x4xbf16>
    %cst_32 = arith.constant dense<0.000000e+00> : vector<8x288xf32>
    %35 = tpu.matmul %34, %32, %cst_32 {dimension_numbers = #tpu.dot_dimension_numbers<[1], [0], [0], [1], [0, 0, 1, 1], [], []>} : vector<8x4xbf16>, vector<4x288xbf16>, vector<8x288xf32> -> vector<8x288xf32>
    %36 = arith.addf %30, %35 : vector<8x288xf32>
    %c0_33 = arith.constant 0 : index
    %c0_34 = arith.constant 0 : index
    %c36 = arith.constant 36 : index
    %37 = vector.load %arg2[%c0_33, %c0_34, %c36] : memref<1x4x326xbf16, #tpu.memory_space<vmem>>, vector<1x4x288xbf16>
    %38 = vector.shape_cast %37 : vector<1x4x288xbf16> to vector<4x288xbf16>
    %c6 = arith.constant 6 : index
    %c0_35 = arith.constant 0 : index
    %c0_36 = arith.constant 0 : index
    %39 = vector.load %arg3[%c6, %c0_35, %c0_36] : memref<9x8x4xbf16, #tpu.memory_space<vmem>>, vector<1x8x4xbf16>
    %40 = vector.shape_cast %39 : vector<1x8x4xbf16> to vector<8x4xbf16>
    %cst_37 = arith.constant dense<0.000000e+00> : vector<8x288xf32>
    %41 = tpu.matmul %40, %38, %cst_37 {dimension_numbers = #tpu.dot_dimension_numbers<[1], [0], [0], [1], [0, 0, 1, 1], [], []>} : vector<8x4xbf16>, vector<4x288xbf16>, vector<8x288xf32> -> vector<8x288xf32>
    %42 = arith.addf %36, %41 : vector<8x288xf32>
    %c0_38 = arith.constant 0 : index
    %c0_39 = arith.constant 0 : index
    %c37 = arith.constant 37 : index
    %43 = vector.load %arg2[%c0_38, %c0_39, %c37] : memref<1x4x326xbf16, #tpu.memory_space<vmem>>, vector<1x4x288xbf16>
    %44 = vector.shape_cast %43 : vector<1x4x288xbf16> to vector<4x288xbf16>
    %c7 = arith.constant 7 : index
    %c0_40 = arith.constant 0 : index
    %c0_41 = arith.constant 0 : index
    %45 = vector.load %arg3[%c7, %c0_40, %c0_41] : memref<9x8x4xbf16, #tpu.memory_space<vmem>>, vector<1x8x4xbf16>
    %46 = vector.shape_cast %45 : vector<1x8x4xbf16> to vector<8x4xbf16>
    %cst_42 = arith.constant dense<0.000000e+00> : vector<8x288xf32>
    %47 = tpu.matmul %46, %44, %cst_42 {dimension_numbers = #tpu.dot_dimension_numbers<[1], [0], [0], [1], [0, 0, 1, 1], [], []>} : vector<8x4xbf16>, vector<4x288xbf16>, vector<8x288xf32> -> vector<8x288xf32>
    %48 = arith.addf %42, %47 : vector<8x288xf32>
    %c0_43 = arith.constant 0 : index
    %c0_44 = arith.constant 0 : index
    %c38 = arith.constant 38 : index
    %49 = vector.load %arg2[%c0_43, %c0_44, %c38] : memref<1x4x326xbf16, #tpu.memory_space<vmem>>, vector<1x4x288xbf16>
    %50 = vector.shape_cast %49 : vector<1x4x288xbf16> to vector<4x288xbf16>
    %c8 = arith.constant 8 : index
    %c0_45 = arith.constant 0 : index
    %c0_46 = arith.constant 0 : index
    %51 = vector.load %arg3[%c8, %c0_45, %c0_46] : memref<9x8x4xbf16, #tpu.memory_space<vmem>>, vector<1x8x4xbf16>
    %52 = vector.shape_cast %51 : vector<1x8x4xbf16> to vector<8x4xbf16>
    %cst_47 = arith.constant dense<0.000000e+00> : vector<8x288xf32>
    %53 = tpu.matmul %52, %50, %cst_47 {dimension_numbers = #tpu.dot_dimension_numbers<[1], [0], [0], [1], [0, 0, 1, 1], [], []>} : vector<8x4xbf16>, vector<4x288xbf16>, vector<8x288xf32> -> vector<8x288xf32>
    %54 = arith.addf %48, %53 : vector<8x288xf32>
    %c0_48 = arith.constant 0 : index
    %c0_49 = arith.constant 0 : index
    %55 = vector.load %arg4[%c0_48, %c0_49] : memref<8x1xf32, #tpu.memory_space<vmem>>, vector<8x1xf32>
    %56 = vector.broadcast %55 : vector<8x1xf32> to vector<8x288xf32>
    %57 = arith.mulf %54, %56 : vector<8x288xf32>
    %c0_50 = arith.constant 0 : index
    %c0_51 = arith.constant 0 : index
    %58 = vector.load %arg5[%c0_50, %c0_51] : memref<8x1xf32, #tpu.memory_space<vmem>>, vector<8x1xf32>
    %59 = vector.broadcast %58 : vector<8x1xf32> to vector<8x288xf32>
    %60 = arith.addf %57, %59 : vector<8x288xf32>
    %cst_52 = arith.constant 0.000000e+00 : f32
    %61 = vector.broadcast %cst_52 : f32 to vector<8x288xf32>
    %62 = arith.maximumf %60, %61 : vector<8x288xf32>
    %c0_53 = arith.constant 0 : index
    %c0_54 = arith.constant 0 : index
    %63 = vector.load %arg7[%c0_53, %c0_54] : memref<8x288xf32, #tpu.memory_space<vmem>>, vector<8x288xf32>
    tpu.vector_store %arg7[%c0_53, %c0_54], %62 {strides = array<i32>} : memref<8x288xf32, #tpu.memory_space<vmem>>, vector<8x288xf32>,
    %c0_55 = arith.constant 0 : index
    %c0_56 = arith.constant 0 : index
    %64 = vector.load %arg7[%c0_55, %c0_56] : memref<8x288xf32, #tpu.memory_space<vmem>>, vector<8x16xf32>
    %c0_57 = arith.constant 0 : index
    %c0_58 = arith.constant 0 : index
    %c0_59 = arith.constant 0 : index
    %c0_60 = arith.constant 0 : index
    %65 = vector.load %arg6[%c0_57, %c0_58, %c0_59, %c0_60] : memref<1x8x16x16xf32, #tpu.memory_space<vmem>>, vector<1x8x1x16xf32>
    %66 = vector.shape_cast %65 : vector<1x8x1x16xf32> to vector<8x16xf32>
    %67 = vector.shape_cast %64 : vector<8x16xf32> to vector<1x8x1x16xf32>
    tpu.vector_store %arg6[%c0_57, %c0_58, %c0_59, %c0_60], %67 {strides = array<i32>} : memref<1x8x16x16xf32, #tpu.memory_space<vmem>>, vector<1x8x1x16xf32>,
    %c0_61 = arith.constant 0 : index
    %c18_62 = arith.constant 18 : index
    %68 = vector.load %arg7[%c0_61, %c18_62] : memref<8x288xf32, #tpu.memory_space<vmem>>, vector<8x16xf32>
    %c0_63 = arith.constant 0 : index
    %c0_64 = arith.constant 0 : index
    %c1_65 = arith.constant 1 : index
    %c0_66 = arith.constant 0 : index
    %69 = vector.load %arg6[%c0_63, %c0_64, %c1_65, %c0_66] : memref<1x8x16x16xf32, #tpu.memory_space<vmem>>, vector<1x8x1x16xf32>
    %70 = vector.shape_cast %69 : vector<1x8x1x16xf32> to vector<8x16xf32>
    %71 = vector.shape_cast %68 : vector<8x16xf32> to vector<1x8x1x16xf32>
    tpu.vector_store %arg6[%c0_63, %c0_64, %c1_65, %c0_66], %71 {strides = array<i32>} : memref<1x8x16x16xf32, #tpu.memory_space<vmem>>, vector<1x8x1x16xf32>,
    %c0_67 = arith.constant 0 : index
    %c36_68 = arith.constant 36 : index
    %72 = vector.load %arg7[%c0_67, %c36_68] : memref<8x288xf32, #tpu.memory_space<vmem>>, vector<8x16xf32>
    %c0_69 = arith.constant 0 : index
    %c0_70 = arith.constant 0 : index
    %c2_71 = arith.constant 2 : index
    %c0_72 = arith.constant 0 : index
    %73 = vector.load %arg6[%c0_69, %c0_70, %c2_71, %c0_72] : memref<1x8x16x16xf32, #tpu.memory_space<vmem>>, vector<1x8x1x16xf32>
    %74 = vector.shape_cast %73 : vector<1x8x1x16xf32> to vector<8x16xf32>
    %75 = vector.shape_cast %72 : vector<8x16xf32> to vector<1x8x1x16xf32>
    tpu.vector_store %arg6[%c0_69, %c0_70, %c2_71, %c0_72], %75 {strides = array<i32>} : memref<1x8x16x16xf32, #tpu.memory_space<vmem>>, vector<1x8x1x16xf32>,
    %c0_73 = arith.constant 0 : index
    %c54 = arith.constant 54 : index
    %76 = vector.load %arg7[%c0_73, %c54] : memref<8x288xf32, #tpu.memory_space<vmem>>, vector<8x16xf32>
    %c0_74 = arith.constant 0 : index
    %c0_75 = arith.constant 0 : index
    %c3_76 = arith.constant 3 : index
    %c0_77 = arith.constant 0 : index
    %77 = vector.load %arg6[%c0_74, %c0_75, %c3_76, %c0_77] : memref<1x8x16x16xf32, #tpu.memory_space<vmem>>, vector<1x8x1x16xf32>
    %78 = vector.shape_cast %77 : vector<1x8x1x16xf32> to vector<8x16xf32>
    %79 = vector.shape_cast %76 : vector<8x16xf32> to vector<1x8x1x16xf32>
    tpu.vector_store %arg6[%c0_74, %c0_75, %c3_76, %c0_77], %79 {strides = array<i32>} : memref<1x8x16x16xf32, #tpu.memory_space<vmem>>, vector<1x8x1x16xf32>,
    %c0_78 = arith.constant 0 : index
    %c72 = arith.constant 72 : index
    %80 = vector.load %arg7[%c0_78, %c72] : memref<8x288xf32, #tpu.memory_space<vmem>>, vector<8x16xf32>
    %c0_79 = arith.constant 0 : index
    %c0_80 = arith.constant 0 : index
    %c4_81 = arith.constant 4 : index
    %c0_82 = arith.constant 0 : index
    %81 = vector.load %arg6[%c0_79, %c0_80, %c4_81, %c0_82] : memref<1x8x16x16xf32, #tpu.memory_space<vmem>>, vector<1x8x1x16xf32>
    %82 = vector.shape_cast %81 : vector<1x8x1x16xf32> to vector<8x16xf32>
    %83 = vector.shape_cast %80 : vector<8x16xf32> to vector<1x8x1x16xf32>
    tpu.vector_store %arg6[%c0_79, %c0_80, %c4_81, %c0_82], %83 {strides = array<i32>} : memref<1x8x16x16xf32, #tpu.memory_space<vmem>>, vector<1x8x1x16xf32>,
    %c0_83 = arith.constant 0 : index
    %c90 = arith.constant 90 : index
    %84 = vector.load %arg7[%c0_83, %c90] : memref<8x288xf32, #tpu.memory_space<vmem>>, vector<8x16xf32>
    %c0_84 = arith.constant 0 : index
    %c0_85 = arith.constant 0 : index
    %c5_86 = arith.constant 5 : index
    %c0_87 = arith.constant 0 : index
    %85 = vector.load %arg6[%c0_84, %c0_85, %c5_86, %c0_87] : memref<1x8x16x16xf32, #tpu.memory_space<vmem>>, vector<1x8x1x16xf32>
    %86 = vector.shape_cast %85 : vector<1x8x1x16xf32> to vector<8x16xf32>
    %87 = vector.shape_cast %84 : vector<8x16xf32> to vector<1x8x1x16xf32>
    tpu.vector_store %arg6[%c0_84, %c0_85, %c5_86, %c0_87], %87 {strides = array<i32>} : memref<1x8x16x16xf32, #tpu.memory_space<vmem>>, vector<1x8x1x16xf32>,
    %c0_88 = arith.constant 0 : index
    %c108 = arith.constant 108 : index
    %88 = vector.load %arg7[%c0_88, %c108] : memref<8x288xf32, #tpu.memory_space<vmem>>, vector<8x16xf32>
    %c0_89 = arith.constant 0 : index
    %c0_90 = arith.constant 0 : index
    %c6_91 = arith.constant 6 : index
    %c0_92 = arith.constant 0 : index
    %89 = vector.load %arg6[%c0_89, %c0_90, %c6_91, %c0_92] : memref<1x8x16x16xf32, #tpu.memory_space<vmem>>, vector<1x8x1x16xf32>
    %90 = vector.shape_cast %89 : vector<1x8x1x16xf32> to vector<8x16xf32>
    %91 = vector.shape_cast %88 : vector<8x16xf32> to vector<1x8x1x16xf32>
    tpu.vector_store %arg6[%c0_89, %c0_90, %c6_91, %c0_92], %91 {strides = array<i32>} : memref<1x8x16x16xf32, #tpu.memory_space<vmem>>, vector<1x8x1x16xf32>,
    %c0_93 = arith.constant 0 : index
    %c126 = arith.constant 126 : index
    %92 = vector.load %arg7[%c0_93, %c126] : memref<8x288xf32, #tpu.memory_space<vmem>>, vector<8x16xf32>
    %c0_94 = arith.constant 0 : index
    %c0_95 = arith.constant 0 : index
    %c7_96 = arith.constant 7 : index
    %c0_97 = arith.constant 0 : index
    %93 = vector.load %arg6[%c0_94, %c0_95, %c7_96, %c0_97] : memref<1x8x16x16xf32, #tpu.memory_space<vmem>>, vector<1x8x1x16xf32>
    %94 = vector.shape_cast %93 : vector<1x8x1x16xf32> to vector<8x16xf32>
    %95 = vector.shape_cast %92 : vector<8x16xf32> to vector<1x8x1x16xf32>
    tpu.vector_store %arg6[%c0_94, %c0_95, %c7_96, %c0_97], %95 {strides = array<i32>} : memref<1x8x16x16xf32, #tpu.memory_space<vmem>>, vector<1x8x1x16xf32>,
    %c0_98 = arith.constant 0 : index
    %c144 = arith.constant 144 : index
    %96 = vector.load %arg7[%c0_98, %c144] : memref<8x288xf32, #tpu.memory_space<vmem>>, vector<8x16xf32>
    %c0_99 = arith.constant 0 : index
    %c0_100 = arith.constant 0 : index
    %c8_101 = arith.constant 8 : index
    %c0_102 = arith.constant 0 : index
    %97 = vector.load %arg6[%c0_99, %c0_100, %c8_101, %c0_102] : memref<1x8x16x16xf32, #tpu.memory_space<vmem>>, vector<1x8x1x16xf32>
    %98 = vector.shape_cast %97 : vector<1x8x1x16xf32> to vector<8x16xf32>
    %99 = vector.shape_cast %96 : vector<8x16xf32> to vector<1x8x1x16xf32>
    tpu.vector_store %arg6[%c0_99, %c0_100, %c8_101, %c0_102], %99 {strides = array<i32>} : memref<1x8x16x16xf32, #tpu.memory_space<vmem>>, vector<1x8x1x16xf32>,
    %c0_103 = arith.constant 0 : index
    %c162 = arith.constant 162 : index
    %100 = vector.load %arg7[%c0_103, %c162] : memref<8x288xf32, #tpu.memory_space<vmem>>, vector<8x16xf32>
    %c0_104 = arith.constant 0 : index
    %c0_105 = arith.constant 0 : index
    %c9 = arith.constant 9 : index
    %c0_106 = arith.constant 0 : index
    %101 = vector.load %arg6[%c0_104, %c0_105, %c9, %c0_106] : memref<1x8x16x16xf32, #tpu.memory_space<vmem>>, vector<1x8x1x16xf32>
    %102 = vector.shape_cast %101 : vector<1x8x1x16xf32> to vector<8x16xf32>
    %103 = vector.shape_cast %100 : vector<8x16xf32> to vector<1x8x1x16xf32>
    tpu.vector_store %arg6[%c0_104, %c0_105, %c9, %c0_106], %103 {strides = array<i32>} : memref<1x8x16x16xf32, #tpu.memory_space<vmem>>, vector<1x8x1x16xf32>,
    %c0_107 = arith.constant 0 : index
    %c180 = arith.constant 180 : index
    %104 = vector.load %arg7[%c0_107, %c180] : memref<8x288xf32, #tpu.memory_space<vmem>>, vector<8x16xf32>
    %c0_108 = arith.constant 0 : index
    %c0_109 = arith.constant 0 : index
    %c10 = arith.constant 10 : index
    %c0_110 = arith.constant 0 : index
    %105 = vector.load %arg6[%c0_108, %c0_109, %c10, %c0_110] : memref<1x8x16x16xf32, #tpu.memory_space<vmem>>, vector<1x8x1x16xf32>
    %106 = vector.shape_cast %105 : vector<1x8x1x16xf32> to vector<8x16xf32>
    %107 = vector.shape_cast %104 : vector<8x16xf32> to vector<1x8x1x16xf32>
    tpu.vector_store %arg6[%c0_108, %c0_109, %c10, %c0_110], %107 {strides = array<i32>} : memref<1x8x16x16xf32, #tpu.memory_space<vmem>>, vector<1x8x1x16xf32>,
    %c0_111 = arith.constant 0 : index
    %c198 = arith.constant 198 : index
    %108 = vector.load %arg7[%c0_111, %c198] : memref<8x288xf32, #tpu.memory_space<vmem>>, vector<8x16xf32>
    %c0_112 = arith.constant 0 : index
    %c0_113 = arith.constant 0 : index
    %c11 = arith.constant 11 : index
    %c0_114 = arith.constant 0 : index
    %109 = vector.load %arg6[%c0_112, %c0_113, %c11, %c0_114] : memref<1x8x16x16xf32, #tpu.memory_space<vmem>>, vector<1x8x1x16xf32>
    %110 = vector.shape_cast %109 : vector<1x8x1x16xf32> to vector<8x16xf32>
    %111 = vector.shape_cast %108 : vector<8x16xf32> to vector<1x8x1x16xf32>
    tpu.vector_store %arg6[%c0_112, %c0_113, %c11, %c0_114], %111 {strides = array<i32>} : memref<1x8x16x16xf32, #tpu.memory_space<vmem>>, vector<1x8x1x16xf32>,
    %c0_115 = arith.constant 0 : index
    %c216 = arith.constant 216 : index
    %112 = vector.load %arg7[%c0_115, %c216] : memref<8x288xf32, #tpu.memory_space<vmem>>, vector<8x16xf32>
    %c0_116 = arith.constant 0 : index
    %c0_117 = arith.constant 0 : index
    %c12 = arith.constant 12 : index
    %c0_118 = arith.constant 0 : index
    %113 = vector.load %arg6[%c0_116, %c0_117, %c12, %c0_118] : memref<1x8x16x16xf32, #tpu.memory_space<vmem>>, vector<1x8x1x16xf32>
    %114 = vector.shape_cast %113 : vector<1x8x1x16xf32> to vector<8x16xf32>
    %115 = vector.shape_cast %112 : vector<8x16xf32> to vector<1x8x1x16xf32>
    tpu.vector_store %arg6[%c0_116, %c0_117, %c12, %c0_118], %115 {strides = array<i32>} : memref<1x8x16x16xf32, #tpu.memory_space<vmem>>, vector<1x8x1x16xf32>,
    %c0_119 = arith.constant 0 : index
    %c234 = arith.constant 234 : index
    %116 = vector.load %arg7[%c0_119, %c234] : memref<8x288xf32, #tpu.memory_space<vmem>>, vector<8x16xf32>
    %c0_120 = arith.constant 0 : index
    %c0_121 = arith.constant 0 : index
    %c13 = arith.constant 13 : index
    %c0_122 = arith.constant 0 : index
    %117 = vector.load %arg6[%c0_120, %c0_121, %c13, %c0_122] : memref<1x8x16x16xf32, #tpu.memory_space<vmem>>, vector<1x8x1x16xf32>
    %118 = vector.shape_cast %117 : vector<1x8x1x16xf32> to vector<8x16xf32>
    %119 = vector.shape_cast %116 : vector<8x16xf32> to vector<1x8x1x16xf32>
    tpu.vector_store %arg6[%c0_120, %c0_121, %c13, %c0_122], %119 {strides = array<i32>} : memref<1x8x16x16xf32, #tpu.memory_space<vmem>>, vector<1x8x1x16xf32>,
    %c0_123 = arith.constant 0 : index
    %c252 = arith.constant 252 : index
    %120 = vector.load %arg7[%c0_123, %c252] : memref<8x288xf32, #tpu.memory_space<vmem>>, vector<8x16xf32>
    %c0_124 = arith.constant 0 : index
    %c0_125 = arith.constant 0 : index
    %c14 = arith.constant 14 : index
    %c0_126 = arith.constant 0 : index
    %121 = vector.load %arg6[%c0_124, %c0_125, %c14, %c0_126] : memref<1x8x16x16xf32, #tpu.memory_space<vmem>>, vector<1x8x1x16xf32>
    %122 = vector.shape_cast %121 : vector<1x8x1x16xf32> to vector<8x16xf32>
    %123 = vector.shape_cast %120 : vector<8x16xf32> to vector<1x8x1x16xf32>
    tpu.vector_store %arg6[%c0_124, %c0_125, %c14, %c0_126], %123 {strides = array<i32>} : memref<1x8x16x16xf32, #tpu.memory_space<vmem>>, vector<1x8x1x16xf32>,
    %c0_127 = arith.constant 0 : index
    %c270 = arith.constant 270 : index
    %124 = vector.load %arg7[%c0_127, %c270] : memref<8x288xf32, #tpu.memory_space<vmem>>, vector<8x16xf32>
    %c0_128 = arith.constant 0 : index
    %c0_129 = arith.constant 0 : index
    %c15 = arith.constant 15 : index
    %c0_130 = arith.constant 0 : index
    %125 = vector.load %arg6[%c0_128, %c0_129, %c15, %c0_130] : memref<1x8x16x16xf32, #tpu.memory_space<vmem>>, vector<1x8x1x16xf32>
    %126 = vector.shape_cast %125 : vector<1x8x1x16xf32> to vector<8x16xf32>
    %127 = vector.shape_cast %124 : vector<8x16xf32> to vector<1x8x1x16xf32>
    tpu.vector_store %arg6[%c0_128, %c0_129, %c15, %c0_130], %127 {strides = array<i32>} : memref<1x8x16x16xf32, #tpu.memory_space<vmem>>, vector<1x8x1x16xf32>,
    return
  }
  func.func @transform_0(%arg0: i32, %arg1: i32) -> (i32, i32, i32) {
    %c0_i32 = arith.constant 0 : i32
    %c0_i32_0 = arith.constant 0 : i32
    %c0_i32_1 = arith.constant 0 : i32
    return %arg0, %c0_i32, %c0_i32_0 : i32, i32, i32
  }
  func.func @transform_1(%arg0: i32, %arg1: i32) -> (i32, i32, i32) {
    %c0_i32 = arith.constant 0 : i32
    %c0_i32_0 = arith.constant 0 : i32
    %c0_i32_1 = arith.constant 0 : i32
    %c0_i32_2 = arith.constant 0 : i32
    return %c0_i32, %c0_i32_0, %c0_i32_1 : i32, i32, i32
  }
  func.func @transform_2(%arg0: i32, %arg1: i32) -> (i32, i32) {
    %c0_i32 = arith.constant 0 : i32
    %c0_i32_0 = arith.constant 0 : i32
    %c0_i32_1 = arith.constant 0 : i32
    return %c0_i32, %c0_i32_0 : i32, i32
  }
  func.func @transform_3(%arg0: i32, %arg1: i32) -> (i32, i32) {
    %c0_i32 = arith.constant 0 : i32
    %c0_i32_0 = arith.constant 0 : i32
    %c0_i32_1 = arith.constant 0 : i32
    return %c0_i32, %c0_i32_0 : i32, i32
  }
  func.func @transform_4(%arg0: i32, %arg1: i32) -> (i32, i32, i32, i32) {
    %c0_i32 = arith.constant 0 : i32
    %c0_i32_0 = arith.constant 0 : i32
    %c0_i32_1 = arith.constant 0 : i32
    return %arg0, %c0_i32, %arg1, %c0_i32_0 : i32, i32, i32, i32
  }
}

</mosaic_0001>

<bundles_post_ra>
// kernel: tpu_custom_call.1
= control target key start
LH: loop header
LB: loop body
LE: loop exit
PB: predicated region body
PF: predicated region fallthrough
CT: control target
= control target key end

     0   :  { %9 = vsyncpa [#allocation4], 0  ;;  %s4837_s0 = inlined_call_operand.vmem [shape: bf16[2,4,326], index: 0, kind: input, shape index: {}]   ;;  %s4838_s1 = inlined_call_operand.vmem [shape: bf16[9,8,4], index: 1, kind: input, shape index: {}]   ;;  %s4839_s2 = inlined_call_operand.vmem [shape: f32[8,1], index: 2, kind: input, shape index: {}]   ;;  %s4840_s3 = inlined_call_operand.vmem [shape: f32[8,1], index: 3, kind: input, shape index: {}]   ;;  %s4841_s4 = inlined_call_operand.hbm [shape: f32[2,8,16,16], index: 4, kind: output, shape index: {}]  }
   0x1   :  { %11 = vsyncpa [#allocation4 + $0x1], 0  ;;  %s3678_s15 = smov 0   ;;  %s3680_s16 = smov 0  }
   0x2   :  { %s3682_s17 = smov 0   ;;  %s3684_s18 = smov 0  }
   0x3   :  { %s3686_s19 = smov 0   ;;  %s3688_s20 = smov 0  }
   0x4 LB: > { %s3331_s21 = sadd.s32 4294967295, %s3622_s20   ;;  %s3332_s22 = sadd.s32 4294967294, %s3622_s20   ;;  %s3622_s20 = sphi %s3688_s20, %s17_s20   ;;  %s3618_s19 = sphi %s3686_s19, %s4851_s19   ;;  %s3614_s18 = sphi %s3684_s18, %s4850_s18   ;;  %s3610_s17 = sphi %s3682_s17, %s4849_s17   ;;  %s3606_s16 = sphi %s3680_s16, %s4848_s16   ;;  %s3602_s15 = sphi %s3678_s15, %s4847_s15  }
   0x5   : > { %s29_s23 = sadd.s32 1, %s3618_s19  ;;  %s127_s24 = sadd.s32 1, %s3610_s17 }
   0x6   : > { %p31_p0 = scmp.ge.s32.totalorder %s29_s23, 2  ;;  %p137_p1 = scmp.ne.s32.totalorder %s3610_s17, %s3606_s16 }
   0x7   : > { %p138_p2 = scmp.eq.s32.totalorder %s3331_s21, 1  ;;  %p143_p3 = scmp.ne.s32.totalorder %s3606_s16, %s3602_s15 }
   0x8   : > { %s4853_s23 = smov (%p31_p0, %s29_s23), 0  ;;  %p144_p5 = scmp.eq.s32.totalorder %s3332_s22, 1 }
   0x9   : > { %p3718_p4 = por %p138_p2, %p137_p1  ;;  %s122_s26 = ssub.s32 %s3618_s19, %s4853_s23 }
   0xa   : > { %p3335_p6 = scmp.ge.s32.totalorder %s3622_s20, 1  ;;  %p125_p7 = scmp.eq.s32.totalorder %s122_s26, 0 }
   0xb   : > { %p3725_p8 = por %p144_p5, %p143_p3  ;;  %p179_p9 = scmp.lt.s32.totalorder %s3622_s20, 3 }
   0xc   : > { %s3731_s28 = scalar_select %p125_p7, %s3610_s17, %s127_s24  }
   0xd   : > { %p180_p10 = pnand %p3335_p6, %p179_p9 }
   0xe   : > { %p205_p11 = scmp.lt.s32.totalorder (!%p180_p10), %s3614_s18, 1  ;;  %s3628_s8 = smov (!%p180_p10), 127  }
   0xf   : > { %183 = sbr.rel (%p180_p10) target bundleno = 828 (0x33c), region = 36  ;;  %s3629_s9 = smov (!%p180_p10), 126  }
  0x10   : > { %s3630_s10 = smov (!%p180_p10), 110   ;;  %s3631_s11 = smov (!%p180_p10), 109  }
  0x11   : > { %s3632_s12 = smov (!%p180_p10), 108   ;;  %s3633_s13 = smov (!%p180_p10), 92  }
  0x12   : > { %s3634_s14 = smov (!%p180_p10), 91   ;;  %s3635_s21 = smov (!%p180_p10), 90  }
  0x13   : > { %s3640_s22 = smov (!%p180_p10), 38   ;;  %s3641_s24 = smov (!%p180_p10), 20  }
  0x14   : > { %v221_v0 = vlaneseq  ;;  %v3624_v1 = vmov 1983009808   ;;  %s206_s29 = scalar_select %p205_p11, %s3614_s18, 1  ;;  %v3625_v4 = vmov 0.0   ;;  %vm3626_vm0 = vmmov 0   ;;  %v1305_v48 = vld [vmem:[%s4839_s2] sm:$0xff] }
  0x15   : > { %v219_v2 = vunpack.c.l.s4 %v3624_v1  ;;  %3397 = vmatprep.subr.bf16.mxu1 %v3625_v4  ;;  %3399 = vmatprep.mubr.msk.bf16.mxu1 %vm3626_vm0, %v3625_v4  ;;  %v3627_v7 = vmov 0   ;;  %v1314_v49 = vld [vmem:[%s4840_s3] sm:$0xff]  ;;  %vm246_vm1 = vcmask 1041408   ;;  %vm239_vm2 = vcmask 1039360   ;;  %s3642_s26 = smov 112   ;;  %s3645_s5 = smov 76  }
  0x16   : > { %v3735_v3 = vshrl.u32 %v221_v0, 7  ;;  %s3451_s30 = smul.u32 6, %s206_s29  ;;  %288 = vmatprep.mubr.bf16.mxu0 %v3627_v7  ;;  %3535 = vset.pattern.permute.xlu0 %v3627_v7  ;;  %v3338_v54 = vld [vmem:[%s4838_s1 + $0x4] sm:$0xf]  ;;  %vm242_vm3 = vcmask 31744   ;;  %vm456_vm4 = vcmask 1031168  }
  0x17   : > { %v220_v5 = vunpack.c.0.s8 %v219_v2  ;;  %3536 = vset.pattern.permute.xlu1 %v3627_v7  ;;  %v213_v0 = vld [vmem:[%s4838_s1] sm:$0xf]  ;;  %vm581_vm5 = vcmask 900096   ;;  %vm706_vm6 = vcmask 891904   ;;  %vm831_vm7 = vcmask 883712   ;;  %s3643_s29 = smov 2  }
  0x18   : > { %s3748_s7 = scalar_lea.vmem %s4837_s0, %s3451_s30  ;;  %vm956_vm8 = vcmask 752640   ;;  %vm1081_vm9 = vcmask 744448   ;;  %vm1206_vm10 = vcmask 736256   ;;  %vm1328_vm11 = vcmask 261120   ;;  %s3644_s30 = smov 94  }
  0x19   : > { %v3741_v6 = vsub.s32 %v220_v5, %v3735_v3  ;;  %v212_v8 = vld [vmem:[%s3748_s7] sm:$0x3f]  ;;  %vm1389_vm12 = vcmask 122880   ;;  %s3646_s6 = smov 58   ;;  %vm2238_vm13 = vcmask 15360  }
  0x1a   : > { %v430_v9 = vld [vmem:[%s3748_s7] sm:$0x3f]  ;;  %v217_v11 = vcombine.high %v212_v8, %v212_v8 }
  0x1b   : > { %v3754_v10 = vrot.slane %v212_v8, %v3741_v6  ;;  %v441_v14 = vrot.slane %v430_v9, %v3741_v6  ;;  %v434_v15 = vcombine.high %v430_v9, %v430_v9  ;;  %v555_v16 = vld [vmem:[%s3748_s7] sm:$0x3f] }
  0x1c   : > { %v3758_v12 = vrot.slane %v217_v11, %v3741_v6  ;;  %v566_v19 = vrot.slane %v555_v16, %v3741_v6  ;;  %v559_v20 = vcombine.high %v555_v16, %v555_v16  ;;  %v680_v21 = vld [vmem:[%s3748_s7] sm:$0x3f] }
  0x1d   : > { %233 = vrot.lane.b32.xlu0 %v3754_v10, %s3628_s8  ;;  %v3762_v13 = vcombine.high %v3754_v10, %v3754_v10  ;;  %v449_v17 = vcombine.high %v441_v14, %v441_v14  ;;  %v448_v18 = vrot.slane %v434_v15, %v3741_v6  ;;  %v691_v24 = vrot.slane %v680_v21, %v3741_v6  ;;  %v805_v26 = vld [vmem:[%s3748_s7] sm:$0x3f] }
  0x1e   : > { %237 = vrot.lane.b32.xlu1 %v3758_v12, %s3628_s8  ;;  %v574_v22 = vcombine.high %v566_v19, %v566_v19  ;;  %v573_v23 = vrot.slane %v559_v20, %v3741_v6  ;;  %v684_v25 = vcombine.high %v680_v21, %v680_v21  ;;  %v816_v29 = vrot.slane %v805_v26, %v3741_v6  ;;  %v930_v31 = vld [vmem:[%s3748_s7] sm:$0x3f]  ;;  %v3349_v21 = vld [vmem:[%s4838_s1 + $0xc] sm:$0xf] }
  0x1f   : > { %v699_v27 = vcombine.high %v691_v24, %v691_v24  ;;  %v809_v30 = vcombine.high %v805_v26, %v805_v26  ;;  %v941_v34 = vrot.slane %v930_v31, %v3741_v6  ;;  %v934_v35 = vcombine.high %v930_v31, %v930_v31  ;;  %v1055_v36 = vld [vmem:[%s3748_s7] sm:$0x3f] }
  0x20   : > { %v698_v28 = vrot.slane %v684_v25, %v3741_v6  ;;  %v824_v32 = vcombine.high %v816_v29, %v816_v29  ;;  %v1066_v39 = vrot.slane %v1055_v36, %v3741_v6  ;;  %v1059_v40 = vcombine.high %v1055_v36, %v1055_v36  ;;  %v1180_v41 = vld [vmem:[%s3748_s7] sm:$0x3f]  ;;  %s3647_s7 = smov 40  }
  0x21   : > { %235 = vrot.lane.b32.xlu0 %v3762_v13, %s3628_s8  ;;  %v823_v33 = vrot.slane %v809_v30, %v3741_v6  ;;  %v949_v37 = vcombine.high %v941_v34, %v941_v34  ;;  %v948_v38 = vrot.slane %v934_v35, %v3741_v6  ;;  %v1191_v44 = vrot.slane %v1180_v41, %v3741_v6  ;;  %s4842_s8 = sand.u32 1, %s3606_s16  }
  0x22   : > { %450 = vrot.lane.b32.xlu1 %v441_v14, %s3629_s9  ;;  %v1074_v42 = vcombine.high %v1066_v39, %v1066_v39  ;;  %v1073_v43 = vrot.slane %v1059_v40, %v3741_v6  ;;  %v1184_v45 = vcombine.high %v1180_v41, %v1180_v41  ;;  %v347_v57 = vsel %vm246_vm1, %v3758_v12, 0  ;;  %v3345_v12 = vld [vmem:[%s4838_s1 + $0x8] sm:$0xf] }
  0x23   : > { %v1199_v46 = vcombine.high %v1191_v44, %v1191_v44  ;;  %v341_v61 = vsel %vm246_vm1, %v3754_v10, 0 }
  0x24   : > { %v1198_v47 = vrot.slane %v1184_v45, %v3741_v6 }
  0x25   : > { %452 = vrot.lane.b32.xlu0 %v449_v17, %s3629_s9 }
  0x26   : > { %454 = vrot.lane.b32.xlu1 %v448_v18, %s3629_s9  ;;  %s3336_s9 = sshll.u32 %s4842_s8, 7  ;;  %s3649_s8 = smov 4  }
  0x29   : > { %575 = vrot.lane.b32.xlu0 %v566_v19, %s3630_s10 }
  0x2a   : > { %577 = vrot.lane.b32.xlu1 %v574_v22, %s3630_s10 }
  0x2d   : > { %579 = vrot.lane.b32.xlu0 %v573_v23, %s3630_s10 }
  0x2e   : > { %700 = vrot.lane.b32.xlu1 %v691_v24, %s3631_s11 }
  0x31   : > { %702 = vrot.lane.b32.xlu0 %v699_v27, %s3631_s11 }
  0x32   : > { %704 = vrot.lane.b32.xlu1 %v698_v28, %s3631_s11  ;;  %s3933_s11 = scalar_lea.vmem [#allocation3], %s3336_s9  ;;  %s3648_s9 = smov 22  }
  0x35   : > { %825 = vrot.lane.b32.xlu0 %v816_v29, %s3632_s12  ;;  %v3353_v29 = vld [vmem:[%s4838_s1 + $0x10] sm:$0xf] }
  0x36   : > { %827 = vrot.lane.b32.xlu1 %v824_v32, %s3632_s12 }
  0x39   : > { %829 = vrot.lane.b32.xlu0 %v823_v33, %s3632_s12  ;;  %s3637_s12 = smov 114  }
  0x3a   : > { %950 = vrot.lane.b32.xlu1 %v941_v34, %s3633_s13 }
  0x3d   : > { %952 = vrot.lane.b32.xlu0 %v949_v37, %s3633_s13  ;;  %v3357_v37 = vld [vmem:[%s4838_s1 + $0x14] sm:$0xf] }
  0x3e   : > { %954 = vrot.lane.b32.xlu1 %v948_v38, %s3633_s13 }
  0x41   : > { %1075 = vrot.lane.b32.xlu0 %v1066_v39, %s3634_s14 }
  0x42   : > { %1077 = vrot.lane.b32.xlu1 %v1074_v42, %s3634_s14 }
  0x45   : > { %1079 = vrot.lane.b32.xlu0 %v1073_v43, %s3634_s14  ;;  %s3638_s14 = smov 74  }
  0x46   : > { %1200 = vrot.lane.b32.xlu1 %v1191_v44, %s3635_s21  ;;  %v3361_v44 = vld [vmem:[%s4838_s1 + $0x18] sm:$0xf] }
  0x49   : > { %1202 = vrot.lane.b32.xlu0 %v1199_v46, %s3635_s21 }
  0x4a   : > { %1204 = vrot.lane.b32.xlu1 %v1198_v47, %s3635_s21  ;;  %s3639_s21 = smov 56  }
  0x4d   : > { %1308 = vperm.xlu0 %3535, %v1305_v48  }
  0x4e   : > { %1317 = vperm.xlu1 %3536, %v1314_v49  }
  0x8f   : > { %v234_v50 = vpop.permute.xlu0 %233 }
  0x90   : > { %v238_v51 = vpop.permute.xlu1 %237 }
  0x91   : > { %v254_v52 = vsel %vm246_vm1, %v238_v51, 0 }
  0x92   : > { %3398 = vmatpush3.bf16.msra.mxu1 %v254_v52 }
  0x93   : > { %v236_v53 = vpop.permute.xlu0 %235  ;;  %3403 = vmatprep.subr.bf16.mxu1 %v3625_v4 }
  0x94   : > { %v241_v55 = vsel %vm239_vm2, %v236_v53, %v238_v51  ;;  %v240_v56 = vsel %vm239_vm2, %v234_v50, %v236_v53  ;;  %v451_v59 = vpop.permute.xlu1 %450  ;;  %v3365_v51 = vld [vmem:[%s4838_s1 + $0x1c] sm:$0xf] }
  0x95   : > { %3339 = vmatprep.subr.msk.bf16.mxu0 %vm246_vm1, %v241_v55  ;;  %v248_v58 = vsel %vm246_vm1, %v240_v56, 0  ;;  %3400 = vmatmul.mubr.msk.bf16.vlgmr.msra.gmra.mxu1 %vm242_vm3, %v3338_v54  ;;  %v3369_v55 = vld [vmem:[%s4838_s1 + $0x20] sm:$0xf] }
  0x96   : > { %271 = vmatpush1.bf16.msra.mxu0 %v248_v58  ;;  %3404 = vmatpush3.bf16.msra.mxu1 %v347_v57 }
  0x97   : > { %v453_v60 = vpop.permute.xlu0 %452  ;;  %3342 = vmatprep.subr.msk.bf16.mxu0 %vm246_vm1, %v3762_v13  ;;  %3405 = vmatprep.mubr.msk.bf16.mxu1 %vm3626_vm0, %v3625_v4 }
  0x98   : > { %3409 = vmatprep.subr.bf16.mxu1 %v3625_v4  ;;  %v455_v62 = vpop.permute.xlu1 %454  ;;  %v457_v2 = vsel %vm456_vm4, %v451_v59, %v453_v60 }
  0x99   : > { %3340 = vmatmul.mubr.msk.bf16.vlgmr.msra.gmra.mxu0 %vm242_vm3, %v3338_v54  ;;  %v458_v63 = vsel %vm456_vm4, %v453_v60, %v455_v62  ;;  %v469_v5 = vsel %vm246_vm1, %v455_v62, 0  ;;  %v463_v8 = vsel %vm246_vm1, %v457_v2, 0 }
  0x9a   : > { %364 = vmatpush1.bf16.msra.mxu0 %v341_v61  ;;  %381 = vmatprep.mubr.bf16.mxu0 %v3627_v7 }
  0x9b   : > { %3346 = vmatprep.subr.msk.bf16.mxu0 %vm246_vm1, %v458_v63  ;;  %v576_v1 = vpop.permute.xlu0 %575 }
  0x9c   : > { %v578_v6 = vpop.permute.xlu1 %577 }
  0x9d   : > { %3406 = vmatmul.mubr.msk.bf16.vlgmr.msra.gmra.mxu1 %vm242_vm3, %v213_v0  ;;  %v582_v14 = vsel %vm581_vm5, %v576_v1, %v578_v6 }
  0x9e   : > { %3410 = vmatpush3.bf16.msra.mxu1 %v469_v5  ;;  %3411 = vmatprep.mubr.msk.bf16.mxu1 %vm3626_vm0, %v3625_v4  ;;  %v588_v17 = vsel %vm246_vm1, %v582_v14, 0 }
  0x9f   : > { %v580_v9 = vpop.permute.xlu0 %579  ;;  %3415 = vmatprep.subr.bf16.mxu1 %v3625_v4 }
  0xa0   : > { %v583_v10 = vsel %vm581_vm5, %v578_v6, %v580_v9  ;;  %v701_v11 = vpop.permute.xlu1 %700  ;;  %v594_v15 = vsel %vm246_vm1, %v580_v9, 0 }
  0xa1   : > { %3343 = vmatmul.mubr.msk.bf16.vlgmr.msra.gmra.mxu0 %vm242_vm3, %v213_v0 }
  0xa2   : > { %486 = vmatpush1.bf16.msra.mxu0 %v463_v8  ;;  %503 = vmatprep.mubr.bf16.mxu0 %v3627_v7 }
  0xa3   : > { %3350 = vmatprep.subr.msk.bf16.mxu0 %vm246_vm1, %v583_v10  ;;  %v703_v13 = vpop.permute.xlu0 %702 }
  0xa4   : > { %v705_v16 = vpop.permute.xlu1 %704  ;;  %v707_v22 = vsel %vm706_vm6, %v701_v11, %v703_v13 }
  0xa5   : > { %3412 = vmatmul.mubr.msk.bf16.vlgmr.msra.gmra.mxu1 %vm242_vm3, %v3345_v12  ;;  %v708_v19 = vsel %vm706_vm6, %v703_v13, %v705_v16  ;;  %v719_v23 = vsel %vm246_vm1, %v705_v16, 0  ;;  %v713_v25 = vsel %vm246_vm1, %v707_v22, 0 }
  0xa6   : > { %3416 = vmatpush3.bf16.msra.mxu1 %v594_v15  ;;  %3417 = vmatprep.mubr.msk.bf16.mxu1 %vm3626_vm0, %v3625_v4 }
  0xa7   : > { %v826_v18 = vpop.permute.xlu0 %825  ;;  %3421 = vmatprep.subr.bf16.mxu1 %v3625_v4 }
  0xa8   : > { %v828_v20 = vpop.permute.xlu1 %827 }
  0xa9   : > { %3347 = vmatmul.mubr.msk.bf16.vlgmr.msra.gmra.mxu0 %vm242_vm3, %v3345_v12  ;;  %v832_v30 = vsel %vm831_vm7, %v826_v18, %v828_v20 }
  0xaa   : > { %611 = vmatpush1.bf16.msra.mxu0 %v588_v17  ;;  %628 = vmatprep.mubr.bf16.mxu0 %v3627_v7  ;;  %v838_v33 = vsel %vm246_vm1, %v832_v30, 0 }
  0xab   : > { %3354 = vmatprep.subr.msk.bf16.mxu0 %vm246_vm1, %v708_v19  ;;  %v830_v24 = vpop.permute.xlu0 %829 }
  0xac   : > { %v951_v26 = vpop.permute.xlu1 %950  ;;  %v833_v27 = vsel %vm831_vm7, %v828_v20, %v830_v24  ;;  %v844_v31 = vsel %vm246_vm1, %v830_v24, 0 }
  0xad   : > { %3418 = vmatmul.mubr.msk.bf16.vlgmr.msra.gmra.mxu1 %vm242_vm3, %v3349_v21 }
  0xae   : > { %3422 = vmatpush3.bf16.msra.mxu1 %v719_v23  ;;  %3423 = vmatprep.mubr.msk.bf16.mxu1 %vm3626_vm0, %v3625_v4 }
  0xaf   : > { %3427 = vmatprep.subr.bf16.mxu1 %v3625_v4  ;;  %v953_v28 = vpop.permute.xlu0 %952 }
  0xb0   : > { %v955_v32 = vpop.permute.xlu1 %954  ;;  %v957_v38 = vsel %vm956_vm8, %v951_v26, %v953_v28 }
  0xb1   : > { %3351 = vmatmul.mubr.msk.bf16.vlgmr.msra.gmra.mxu0 %vm242_vm3, %v3349_v21  ;;  %v958_v35 = vsel %vm956_vm8, %v953_v28, %v955_v32  ;;  %v969_v39 = vsel %vm246_vm1, %v955_v32, 0  ;;  %v963_v41 = vsel %vm246_vm1, %v957_v38, 0 }
  0xb2   : > { %736 = vmatpush1.bf16.msra.mxu0 %v713_v25  ;;  %753 = vmatprep.mubr.bf16.mxu0 %v3627_v7 }
  0xb3   : > { %3358 = vmatprep.subr.msk.bf16.mxu0 %vm246_vm1, %v833_v27  ;;  %v1076_v34 = vpop.permute.xlu0 %1075 }
  0xb4   : > { %v1078_v36 = vpop.permute.xlu1 %1077 }
  0xb5   : > { %3424 = vmatmul.mubr.msk.bf16.vlgmr.msra.gmra.mxu1 %vm242_vm3, %v3353_v29  ;;  %v1082_v45 = vsel %vm1081_vm9, %v1076_v34, %v1078_v36 }
  0xb6   : > { %3428 = vmatpush3.bf16.msra.mxu1 %v844_v31  ;;  %3429 = vmatprep.mubr.msk.bf16.mxu1 %vm3626_vm0, %v3625_v4  ;;  %v1088_v49 = vsel %vm246_vm1, %v1082_v45, 0 }
  0xb7   : > { %3433 = vmatprep.subr.bf16.mxu1 %v3625_v4  ;;  %v1080_v40 = vpop.permute.xlu0 %1079 }
  0xb8   : > { %v1201_v42 = vpop.permute.xlu1 %1200  ;;  %v1083_v43 = vsel %vm1081_vm9, %v1078_v36, %v1080_v40  ;;  %v1094_v46 = vsel %vm246_vm1, %v1080_v40, 0 }
  0xb9   : > { %3355 = vmatmul.mubr.msk.bf16.vlgmr.msra.gmra.mxu0 %vm242_vm3, %v3353_v29 }
  0xba   : > { %861 = vmatpush1.bf16.msra.mxu0 %v838_v33  ;;  %878 = vmatprep.mubr.bf16.mxu0 %v3627_v7 }
  0xbb   : > { %3362 = vmatprep.subr.msk.bf16.mxu0 %vm246_vm1, %v958_v35  ;;  %v1203_v47 = vpop.permute.xlu0 %1202 }
  0xbc   : > { %v1205_v48 = vpop.permute.xlu1 %1204  ;;  %v1207_v52 = vsel %vm1206_vm10, %v1201_v42, %v1203_v47 }
  0xbd   : > { %3430 = vmatmul.mubr.msk.bf16.vlgmr.msra.gmra.mxu1 %vm242_vm3, %v3357_v37  ;;  %v1208_v50 = vsel %vm1206_vm10, %v1203_v47, %v1205_v48  ;;  %v1219_v53 = vsel %vm246_vm1, %v1205_v48, 0  ;;  %v1213_v54 = vsel %vm246_vm1, %v1207_v52, 0 }
  0xbe   : > { %3434 = vmatpush3.bf16.msra.mxu1 %v969_v39  ;;  %3435 = vmatprep.mubr.msk.bf16.mxu1 %vm3626_vm0, %v3625_v4 }
  0xbf   : > { %3439 = vmatprep.subr.bf16.mxu1 %v3625_v4 }
  0xc1   : > { %3359 = vmatmul.mubr.msk.bf16.vlgmr.msra.gmra.mxu0 %vm242_vm3, %v3357_v37 }
  0xc2   : > { %986 = vmatpush1.bf16.msra.mxu0 %v963_v41  ;;  %1003 = vmatprep.mubr.bf16.mxu0 %v3627_v7 }
  0xc3   : > { %3366 = vmatprep.subr.msk.bf16.mxu0 %vm246_vm1, %v1083_v43 }
  0xc5   : > { %3436 = vmatmul.mubr.msk.bf16.vlgmr.msra.gmra.mxu1 %vm242_vm3, %v3361_v44 }
  0xc6   : > { %3440 = vmatpush3.bf16.msra.mxu1 %v1094_v46  ;;  %3441 = vmatprep.mubr.msk.bf16.mxu1 %vm3626_vm0, %v3625_v4 }
  0xc7   : > { %3445 = vmatprep.subr.bf16.mxu1 %v3625_v4 }
  0xc9   : > { %3363 = vmatmul.mubr.msk.bf16.vlgmr.msra.gmra.mxu0 %vm242_vm3, %v3361_v44 }
  0xca   : > { %1111 = vmatpush1.bf16.msra.mxu0 %v1088_v49  ;;  %1128 = vmatprep.mubr.bf16.mxu0 %v3627_v7 }
  0xcb   : > { %3370 = vmatprep.subr.msk.bf16.mxu0 %vm246_vm1, %v1208_v50 }
  0xcd   : > { %3442 = vmatmul.mubr.msk.bf16.vlgmr.msra.gmra.mxu1 %vm242_vm3, %v3365_v51 }
  0xce   : > { %3446 = vmatpush3.bf16.msra.mxu1 %v1219_v53  ;;  %3447 = vmatprep.mubr.msk.bf16.mxu1 %vm3626_vm0, %v3625_v4 }
  0xd1   : > { %3367 = vmatmul.mubr.msk.bf16.vlgmr.msra.gmra.mxu0 %vm242_vm3, %v3365_v51 }
  0xd2   : > { %1236 = vmatpush1.bf16.msra.mxu0 %v1213_v54  ;;  %1253 = vmatprep.mubr.bf16.mxu0 %v3627_v7 }
  0xd5   : > { %3448 = vmatmul.mubr.msk.bf16.vlgmr.msra.gmra.mxu1 %vm242_vm3, %v3369_v55 }
  0xd9   : > { %3371 = vmatmul.mubr.msk.bf16.vlgmr.msra.gmra.mxu0 %vm242_vm3, %v3369_v55 }
 0x155   : > { %v331_v56 = vpop.f32.mrf.mxu1 }
 0x157   : > { %v3401_v57 = vpop.f32.mrf.mxu1 }
 0x159   : > { %v290_v58 = vpop.f32.mrf.mxu0  ;;  %v334_v59 = vpop.f32.mrf.mxu1 }
 0x15b   : > { %v292_v60 = vpop.f32.mrf.mxu0  ;;  %v3402_v61 = vpop.f32.mrf.mxu1 }
 0x15d   : > { %v294_v4 = vpop.f32.mrf.mxu0  ;;  %v424_v62 = vpop.f32.mrf.mxu1 }
 0x15e   : > { %v425_v43 = vadd.f32 %v424_v62, %v331_v56 }
 0x15f   : > { %v295_v63 = vpop.f32.mrf.mxu0  ;;  %v3407_v0 = vpop.f32.mrf.mxu1 }
 0x161   : > { %v383_v1 = vpop.f32.mrf.mxu0  ;;  %v427_v7 = vpop.f32.mrf.mxu1 }
 0x162   : > { %v384_v48 = vadd.f32 %v383_v1, %v290_v58 }
 0x163   : > { %v385_v2 = vpop.f32.mrf.mxu0  ;;  %v3408_v5 = vpop.f32.mrf.mxu1 }
 0x164   : > { %v386_v52 = vadd.f32 %v385_v2, %v292_v60  ;;  %v3636_v60 = vmov 1966171168  }
 0x165   : > { %v387_v6 = vpop.f32.mrf.mxu0  ;;  %v546_v8 = vpop.f32.mrf.mxu1  ;;  %v1334_v2 = vunpack.c.l.s4 %v3636_v60 }
 0x166   : > { %v554_v46 = vadd.f32 %v546_v8, %v425_v43 }
 0x167   : > { %v388_v9 = vpop.f32.mrf.mxu0  ;;  %v3413_v10 = vpop.f32.mrf.mxu1 }
 0x169   : > { %v505_v11 = vpop.f32.mrf.mxu0  ;;  %v549_v12 = vpop.f32.mrf.mxu1 }
 0x16a   : > { %v552_v53 = vadd.f32 %v505_v11, %v384_v48 }
 0x16b   : > { %v507_v13 = vpop.f32.mrf.mxu0  ;;  %v3414_v14 = vpop.f32.mrf.mxu1 }
 0x16c   : > { %v553_v59 = vadd.f32 %v507_v13, %v386_v52  ;;  %v1309_v13 = vpop.permute.xlu0 %1308 }
 0x16d   : > { %v509_v15 = vpop.f32.mrf.mxu0  ;;  %v671_v16 = vpop.f32.mrf.mxu1 }
 0x16e   : > { %v679_v50 = vadd.f32 %v671_v16, %v554_v46 }
 0x16f   : > { %v510_v17 = vpop.f32.mrf.mxu0  ;;  %v3419_v18 = vpop.f32.mrf.mxu1 }
 0x171   : > { %v630_v19 = vpop.f32.mrf.mxu0  ;;  %v674_v20 = vpop.f32.mrf.mxu1 }
 0x172   : > { %v677_v61 = vadd.f32 %v630_v19, %v552_v53  ;;  %v1318_v20 = vpop.permute.xlu1 %1317 }
 0x173   : > { %v632_v21 = vpop.f32.mrf.mxu0  ;;  %v3420_v22 = vpop.f32.mrf.mxu1 }
 0x174   : > { %v678_v7 = vadd.f32 %v632_v21, %v553_v59 }
 0x175   : > { %v634_v23 = vpop.f32.mrf.mxu0  ;;  %v796_v24 = vpop.f32.mrf.mxu1 }
 0x176   : > { %v804_v55 = vadd.f32 %v796_v24, %v679_v50  ;;  %v1335_v23 = vunpack.c.0.s8 %v1334_v2 }
 0x177   : > { %v635_v25 = vpop.f32.mrf.mxu0  ;;  %v3425_v26 = vpop.f32.mrf.mxu1 }
 0x179   : > { %v755_v27 = vpop.f32.mrf.mxu0  ;;  %v799_v28 = vpop.f32.mrf.mxu1 }
 0x17a   : > { %v802_v56 = vadd.f32 %v755_v27, %v677_v61  ;;  %v3949_v61 = vsub.s32 0, %v3735_v3 }
 0x17b   : > { %v757_v29 = vpop.f32.mrf.mxu0  ;;  %v3426_v30 = vpop.f32.mrf.mxu1 }
 0x17c   : > { %v803_v8 = vadd.f32 %v757_v29, %v678_v7 }
 0x17d   : > { %v759_v31 = vpop.f32.mrf.mxu0  ;;  %v921_v32 = vpop.f32.mrf.mxu1 }
 0x17e   : > { %v929_v63 = vadd.f32 %v921_v32, %v804_v55 }
 0x17f   : > { %v760_v33 = vpop.f32.mrf.mxu0  ;;  %v3431_v34 = vpop.f32.mrf.mxu1 }
 0x180   : > { %v3909_v34 = vsub.s32 %v1335_v23, %v3735_v3 }
 0x181   : > { %v880_v35 = vpop.f32.mrf.mxu0  ;;  %v924_v36 = vpop.f32.mrf.mxu1 }
 0x182   : > { %v927_v58 = vadd.f32 %v880_v35, %v802_v56 }
 0x183   : > { %v882_v37 = vpop.f32.mrf.mxu0  ;;  %v3432_v38 = vpop.f32.mrf.mxu1 }
 0x184   : > { %v928_v11 = vadd.f32 %v882_v37, %v803_v8 }
 0x185   : > { %v884_v39 = vpop.f32.mrf.mxu0  ;;  %v1046_v40 = vpop.f32.mrf.mxu1 }
 0x186   : > { %v1054_v5 = vadd.f32 %v1046_v40, %v929_v63 }
 0x187   : > { %v885_v41 = vpop.f32.mrf.mxu0  ;;  %v3437_v42 = vpop.f32.mrf.mxu1 }
 0x189   : > { %v1005_v44 = vpop.f32.mrf.mxu0  ;;  %v1049_v45 = vpop.f32.mrf.mxu1 }
 0x18a   : > { %v1052_v12 = vadd.f32 %v1005_v44, %v927_v58 }
 0x18b   : > { %v1007_v47 = vpop.f32.mrf.mxu0  ;;  %v3438_v49 = vpop.f32.mrf.mxu1 }
 0x18c   : > { %v1053_v17 = vadd.f32 %v1007_v47, %v928_v11 }
 0x18d   : > { %v1009_v51 = vpop.f32.mrf.mxu0  ;;  %v1171_v54 = vpop.f32.mrf.mxu1 }
 0x18e   : > { %v1179_v9 = vadd.f32 %v1171_v54, %v1054_v5 }
 0x18f   : > { %v1010_v57 = vpop.f32.mrf.mxu0  ;;  %v3443_v4 = vpop.f32.mrf.mxu1 }
 0x191   : > { %v1130_v0 = vpop.f32.mrf.mxu0  ;;  %v1174_v62 = vpop.f32.mrf.mxu1 }
 0x192   : > { %v1177_v18 = vadd.f32 %v1130_v0, %v1052_v12 }
 0x193   : > { %v1132_v6 = vpop.f32.mrf.mxu0  ;;  %v3444_v1 = vpop.f32.mrf.mxu1 }
 0x194   : > { %v1178_v24 = vadd.f32 %v1132_v6, %v1053_v17  ;;  %v3967_v6 = vsub.s32 1, %v3735_v3 }
 0x195   : > { %v1134_v10 = vpop.f32.mrf.mxu0  ;;  %v1296_v14 = vpop.f32.mrf.mxu1 }
 0x196   : > { %v1304_v15 = vadd.f32 %v1296_v14, %v1179_v9 }
 0x197   : > { %v1135_v16 = vpop.f32.mrf.mxu0  ;;  %v3449_v19 = vpop.f32.mrf.mxu1 }
 0x198   : > { %v1313_v21 = vmul.f32 %v1309_v13, %v1304_v15 }
 0x199   : > { %v1255_v22 = vpop.f32.mrf.mxu0  ;;  %v1299_v26 = vpop.f32.mrf.mxu1 }
 0x19a   : > { %v1302_v25 = vadd.f32 %v1255_v22, %v1177_v18  ;;  %v1322_v27 = vadd.f32 %v1318_v20, %v1313_v21 }
 0x19b   : > { %v1257_v28 = vpop.f32.mrf.mxu0  ;;  %v3450_v31 = vpop.f32.mrf.mxu1 }
 0x19c   : > { %v1311_v29 = vmul.f32 %v1309_v13, %v1302_v25  ;;  %v1303_v30 = vadd.f32 %v1257_v28, %v1178_v24  ;;  %v1325_v32 = vmax.f32 %v1322_v27, 0.0 }
 0x19d   : > { %v1259_v33 = vpop.f32.mrf.mxu0 }
 0x19e   : > { %v1320_v35 = vadd.f32 %v1318_v20, %v1311_v29  ;;  %v1312_v36 = vmul.f32 %v1309_v13, %v1303_v30  ;;  %1329 = vst.msk [vmem:[#allocation2 + $0x10] sm:$0xff] %vm1328_vm11, %v1325_v32 }
 0x19f   : > { %v1260_v37 = vpop.f32.mrf.mxu0 }
 0x1a0   : > { %v3913_v38 = vmax.f32 %v1320_v35, 0.0  ;;  %v1321_v39 = vadd.f32 %v1318_v20, %v1312_v36 }
 0x1a2   : > { %v1332_v40 = vcombine.high %v3913_v38, %v3913_v38  ;;  %v1339_v41 = vrot.slane %v3913_v38, %v3909_v34  ;;  %v3919_v42 = vmax.f32 %v1321_v39, 0.0 }
 0x1a4   : > { %v1346_v43 = vrot.slane %v1332_v40, %v3909_v34  ;;  %v1347_v44 = vcombine.high %v1339_v41, %v1339_v41  ;;  %v1355_v45 = vrot.slane %v1339_v41, %v3909_v34  ;;  %v3925_v46 = vrot.slane %v3919_v42, %v3909_v34 }
 0x1a5   : > { %v2092_v47 = vcombine.low %v3913_v38, %v3919_v42  ;;  %v2093_v48 = vcombine.high %v3913_v38, %v3919_v42  ;;  %v3937_v53 = vld [vmem:[#allocation2 + $0x10] sm:$0xff]  ;;  %v2265_v1 = vcombine.high %v3919_v42, %v3919_v42 }
 0x1a6   : > { %v1348_v49 = vcombine.high %v1346_v43, %v1346_v43  ;;  %v1362_v50 = vrot.slane %v1346_v43, %v3909_v34  ;;  %v1369_v51 = vrot.slane %v1347_v44, %v3909_v34  ;;  %v1377_v52 = vcombine.high %v1355_v45, %v1355_v45  ;;  %1390 = vst.msk [vmem:[%s3933_s11] sm:$0x1] %vm1389_vm12, %v1355_v45 }
 0x1a7   : > { %v3136_v54 = vrot.slane %v3937_v53, %v3909_v34  ;;  %v3129_v62 = vcombine.high %v3937_v53, %v3937_v53  ;;  %v3970_v8 = vrot.slane %v1355_v45, %v3949_v61  ;;  %v2288_v18 = vrot.slane %v3925_v46, %v3909_v34 }
 0x1a8   : > { %v1376_v55 = vrot.slane %v1348_v49, %v3909_v34  ;;  %v1378_v57 = vcombine.high %v1362_v50, %v1362_v50  ;;  %v1379_v59 = vcombine.high %v1369_v51, %v1369_v51  ;;  %1391 = vst.msk [vmem:[%s3933_s11 + $0x10] sm:$0x1] %vm1389_vm12, %v1369_v51  ;;  %1392 = vst.msk [vmem:[%s3933_s11 + $0x20] sm:$0x1] %vm1389_vm12, %v1377_v52 }
 0x1a9   : > { %1394 = vst.msk [vmem:[%s3933_s11 + $0x40] sm:$0x1] %vm1389_vm12, %v1362_v50  ;;  %v3152_v4 = vrot.slane %v3136_v54, %v3909_v34  ;;  %v3144_v63 = vcombine.high %v3136_v54, %v3136_v54  ;;  %v3143_v58 = vrot.slane %v3129_v62, %v3909_v34  ;;  %v3977_v9 = vrot.slane %v1369_v51, %v3949_v61 }
 0x1aa   : > { %v1380_v0 = vcombine.high %v1376_v55, %v1376_v55  ;;  %1393 = vst.msk [vmem:[%s3933_s11 + $0x30] sm:$0x1] %vm1389_vm12, %v1379_v59  ;;  %1395 = vst.msk [vmem:[%s3933_s11 + $0x50] sm:$0x1] %vm1389_vm12, %v1376_v55  ;;  %v3988_v12 = vrot.slane %v1362_v50, %v3949_v61  ;;  %v3993_v14 = vrot.slane %v1376_v55, %v3949_v61 }
 0x1ab   : > { %1396 = vst.msk [vmem:[%s3933_s11 + $0x60] sm:$0x1] %vm1389_vm12, %v1378_v57  ;;  %v3181_v7 = vrot.slane %v3152_v4, %v3949_v61  ;;  %v3166_v56 = vrot.slane %v3144_v63, %v3909_v34  ;;  %v3174_v10 = vcombine.high %v3152_v4, %v3152_v4  ;;  %v3145_v2 = vcombine.high %v3143_v58, %v3143_v58 }
 0x1ac   : > { %1397 = vst.msk [vmem:[%s3933_s11 + $0x70] sm:$0x1] %vm1389_vm12, %v1380_v0  ;;  %v3982_v3 = vrot.slane %v3143_v58, %v3909_v34  ;;  %v3996_v13 = vrot.slane %v1377_v52, %v3949_v61  ;;  %v3999_v15 = vrot.slane %v1379_v59, %v3949_v61  ;;  %v2100_v19 = vrot.slane %v2092_v47, %v3909_v34 }
 0x1ad   : > { %3210 = vrot.lane.b32.xlu1 %v3181_v7, %s3637_s12  ;;  %v3185_v5 = vrot.slane %v3166_v56, %v3949_v61  ;;  %v3176_v60 = vcombine.high %v3166_v56, %v3166_v56  ;;  %v3985_v11 = vrot.slane %v3145_v2, %v3909_v34  ;;  %v4002_v16 = vrot.slane %v3174_v10, %v3949_v61 }
 0x1ae   : > { %v2107_v20 = vrot.slane %v2093_v48, %v3909_v34  ;;  %v2280_v21 = vcombine.high %v3925_v46, %v3925_v46  ;;  %v4016_v22 = vrot.slane %v1378_v57, %v3949_v61  ;;  %v3197_v23 = vrot.slane %v3982_v3, %v3949_v61 }
 0x1af   : > { %3212 = vrot.lane.b32.xlu0 %v3185_v5, %s3637_s12  ;;  %v4005_v17 = vrot.slane %v3176_v60, %v3949_v61  ;;  %v3175_v24 = vcombine.high %v3982_v3, %v3982_v3  ;;  %v3201_v25 = vrot.slane %v3985_v11, %v3949_v61  ;;  %v4027_v26 = vrot.slane %v2288_v18, %v3949_v61 }
 0x1b0   : > { %v3177_v27 = vcombine.high %v3985_v11, %v3985_v11  ;;  %v4032_v28 = vrot.slane %v2100_v19, %v3909_v34  ;;  %v2425_v29 = vcombine.high %v2288_v18, %v2288_v18  ;;  %v4035_v30 = vrot.slane %v2107_v20, %v3909_v34 }
 0x1b1   : > { %1481 = vrot.lane.b32.xlu1 %v3970_v8, %s3630_s10  ;;  %v2302_v31 = vrot.slane %v2280_v21, %v3909_v34  ;;  %v2108_v32 = vcombine.high %v2100_v19, %v2100_v19  ;;  %v2109_v33 = vcombine.high %v2107_v20, %v2107_v20  ;;  %v2957_v35 = vcombine.low %v3919_v42, %v3937_v53 }
 0x1b2   : > { %v2958_v37 = vcombine.high %v3919_v42, %v3937_v53  ;;  %v4051_v39 = vrot.slane %v1380_v0, %v3949_v61  ;;  %v2145_v41 = vrot.slane %v4032_v28, %v3949_v61  ;;  %v2177_v42 = vrot.slane %v4035_v30, %v3949_v61 }
 0x1b3   : > { %1483 = vrot.lane.b32.xlu0 %v3977_v9, %s3630_s10  ;;  %v4045_v36 = vrot.slane %v2302_v31, %v3949_v61  ;;  %v2965_v38 = vrot.slane %v2957_v35, %v3909_v34  ;;  %v2312_v44 = vcombine.high %v2302_v31, %v2302_v31  ;;  %v2279_v47 = vrot.slane %v2265_v1, %v3909_v34 }
 0x1b4   : > { %v2972_v40 = vrot.slane %v2958_v37, %v3909_v34  ;;  %v4070_v48 = vrot.slane %v2425_v29, %v3949_v61  ;;  %v4075_v50 = vrot.slane %v2108_v32, %v3909_v34  ;;  %v4079_v51 = vcombine.high %v4032_v28, %v4032_v28 }
 0x1b5   : > { %1596 = vrot.lane.b32.xlu1 %v3970_v8, %s3633_s13  ;;  %v4059_v43 = vrot.slane %v2965_v38, %v3909_v34  ;;  %v2973_v46 = vcombine.high %v2965_v38, %v2965_v38  ;;  %v2295_v52 = vrot.slane %v2279_v47, %v3909_v34  ;;  %v4083_v53 = vrot.slane %v2109_v33, %v3909_v34 }
 0x1b6   : > { %v4066_v45 = vrot.slane %v2972_v40, %v3909_v34  ;;  %v2974_v49 = vcombine.high %v2972_v40, %v2972_v40  ;;  %v4087_v54 = vcombine.high %v4035_v30, %v4035_v30  ;;  %v2157_v55 = vrot.slane %v4075_v50, %v3967_v6 }
 0x1b7   : > { %1598 = vrot.lane.b32.xlu0 %v3977_v9, %s3633_s13  ;;  %v2165_v57 = vrot.slane %v4079_v51, %v3967_v6  ;;  %v4096_v59 = vrot.slane %v2312_v44, %v3949_v61  ;;  %v4099_v4 = vrot.slane %v2295_v52, %v3949_v61  ;;  %v2189_v63 = vrot.slane %v4083_v53, %v3967_v6 }
 0x1b8   : > { %v2197_v0 = vrot.slane %v4087_v54, %v3967_v6  ;;  %v2281_v7 = vcombine.high %v2279_v47, %v2279_v47  ;;  %v3010_v56 = vrot.slane %v4059_v43, %v3949_v61  ;;  %v3042_v62 = vrot.slane %v4066_v45, %v3949_v61 }
 0x1b9   : > { %1711 = vrot.lane.b32.xlu1 %v3970_v8, %s3638_s14  ;;  %v2153_v58 = vrot.slane %v4075_v50, %v3949_v61  ;;  %v2161_v1 = vrot.slane %v4079_v51, %v3949_v61  ;;  %v2185_v10 = vrot.slane %v4083_v53, %v3949_v61  ;;  %v2193_v60 = vrot.slane %v4087_v54, %v3949_v61 }
 0x1ba   : > { %v2309_v5 = vrot.slane %v2281_v7, %v3909_v34  ;;  %v4127_v2 = vcombine.high %v4059_v43, %v4059_v43  ;;  %v2311_v18 = vcombine.high %v2295_v52, %v2295_v52  ;;  %v4133_v20 = vrot.slane %v2974_v49, %v3909_v34 }
 0x1bb   : > { %1713 = vrot.lane.b32.xlu0 %v3977_v9, %s3638_s14  ;;  %v4141_v21 = vcombine.high %v4075_v50, %v4075_v50  ;;  %v4162_v37 = vcombine.high %v4083_v53, %v4083_v53  ;;  %v4203_v52 = vrot.slane %v3177_v27, %v3949_v61  ;;  %v2149_v11 = vrot.slane %v4032_v28, %v3967_v6 }
 0x1bc   : > { %v4130_v19 = vrot.slane %v2309_v5, %v3949_v61  ;;  %v3030_v31 = vrot.slane %v4127_v2, %v3967_v6  ;;  %v3054_v33 = vrot.slane %v4133_v20, %v3967_v6  ;;  %v3026_v38 = vrot.slane %v4127_v2, %v3949_v61 }
 0x1bd   : > { %1826 = vrot.lane.b32.xlu1 %v3970_v8, %s3639_s21  ;;  %v2313_v40 = vcombine.high %v2309_v5, %v2309_v5  ;;  %v3050_v44 = vrot.slane %v4133_v20, %v3949_v61  ;;  %v2205_v47 = vrot.slane %v4162_v37, %v3967_v6  ;;  %v2169_v49 = vrot.slane %v4141_v21, %v3949_v61 }
 0x1be   : > { %v4191_v5 = vcombine.high %v4133_v20, %v4133_v20  ;;  %v3046_v27 = vrot.slane %v4066_v45, %v3967_v6 }
 0x1bf   : > { %1828 = vrot.lane.b32.xlu0 %v3977_v9, %s3639_s21  ;;  %v4187_v7 = vrot.slane %v2313_v40, %v3949_v61 }
 0x1c0   : > { %v3070_v3 = vrot.slane %v4191_v5, %v3967_v6 }
 0x1c1   : > { %1941 = vrot.lane.b32.xlu1 %v3970_v8, %s3640_s22 }
 0x1c3   : > { %1943 = vrot.lane.b32.xlu0 %v3977_v9, %s3640_s22 }
 0x1c5   : > { %2056 = vrot.lane.b32.xlu1 %v3970_v8, %s3641_s24  ;;  %v4121_v8 = vrot.slane %v2973_v46, %v3909_v34  ;;  %v4150_v34 = vrot.slane %v2311_v18, %v3949_v61  ;;  %v4197_v18 = vrot.slane %v3175_v24, %v3949_v61  ;;  %v3066_v24 = vrot.slane %v4191_v5, %v3949_v61 }
 0x1c7   : > { %2058 = vrot.lane.b32.xlu0 %v3977_v9, %s3641_s24  ;;  %v4137_v9 = vcombine.high %v4066_v45, %v4066_v45  ;;  %v3022_v29 = vrot.slane %v4121_v8, %v3967_v6  ;;  %v3018_v32 = vrot.slane %v4121_v8, %v3949_v61 }
 0x1c9   : > { %3214 = vrot.lane.b32.xlu1 %v4002_v16, %s3637_s12  ;;  %v3062_v35 = vrot.slane %v4137_v9, %v3967_v6  ;;  %v2173_v16 = vrot.slane %v4141_v21, %v3967_v6  ;;  %v3058_v46 = vrot.slane %v4137_v9, %v3949_v61 }
 0x1cb   : > { %3216 = vrot.lane.b32.xlu0 %v4005_v17, %s3637_s12  ;;  %v4180_v17 = vcombine.high %v4121_v8, %v4121_v8 }
 0x1cd   : > { %3218 = vrot.lane.b32.xlu1 %v3197_v23, %s3637_s12  ;;  %v3038_v23 = vrot.slane %v4180_v17, %v3967_v6  ;;  %v3034_v40 = vrot.slane %v4180_v17, %v3949_v61 }
 0x1cf   : > { %3220 = vrot.lane.b32.xlu0 %v3201_v25, %s3637_s12 }
 0x1d1   : > { %1485 = vrot.lane.b32.xlu1 %v3996_v13, %s3630_s10 }
 0x1d3   : > { %1487 = vrot.lane.b32.xlu0 %v3999_v15, %s3630_s10 }
 0x1d5   : > { %1489 = vrot.lane.b32.xlu1 %v3988_v12, %s3630_s10 }
 0x1d7   : > { %1491 = vrot.lane.b32.xlu0 %v3993_v14, %s3630_s10 }
 0x1d9   : > { %1600 = vrot.lane.b32.xlu1 %v3996_v13, %s3633_s13 }
 0x1db   : > { %1602 = vrot.lane.b32.xlu0 %v3999_v15, %s3633_s13 }
 0x1dd   : > { %1604 = vrot.lane.b32.xlu1 %v3988_v12, %s3633_s13 }
 0x1df   : > { %1606 = vrot.lane.b32.xlu0 %v3993_v14, %s3633_s13 }
 0x1e1   : > { %1715 = vrot.lane.b32.xlu1 %v3996_v13, %s3638_s14 }
 0x1e3   : > { %1717 = vrot.lane.b32.xlu0 %v3999_v15, %s3638_s14 }
 0x1e5   : > { %1719 = vrot.lane.b32.xlu1 %v3988_v12, %s3638_s14 }
 0x1e7   : > { %1721 = vrot.lane.b32.xlu0 %v3993_v14, %s3638_s14 }
 0x1e9   : > { %1830 = vrot.lane.b32.xlu1 %v3996_v13, %s3639_s21 }
 0x1eb   : > { %1832 = vrot.lane.b32.xlu0 %v3999_v15, %s3639_s21 }
 0x1ed   : > { %1834 = vrot.lane.b32.xlu1 %v3988_v12, %s3639_s21 }
 0x1ef   : > { %1836 = vrot.lane.b32.xlu0 %v3993_v14, %s3639_s21 }
 0x1f1   : > { %1945 = vrot.lane.b32.xlu1 %v3996_v13, %s3640_s22 }
 0x1f3   : > { %1947 = vrot.lane.b32.xlu0 %v3999_v15, %s3640_s22 }
 0x1f5   : > { %1949 = vrot.lane.b32.xlu1 %v3988_v12, %s3640_s22 }
 0x1f7   : > { %1951 = vrot.lane.b32.xlu0 %v3993_v14, %s3640_s22 }
 0x1f9   : > { %2060 = vrot.lane.b32.xlu1 %v3996_v13, %s3641_s24 }
 0x1fb   : > { %2062 = vrot.lane.b32.xlu0 %v3999_v15, %s3641_s24  ;;  %v3014_v15 = vrot.slane %v4059_v43, %v3967_v6 }
 0x1fd   : > { %2064 = vrot.lane.b32.xlu1 %v3988_v12, %s3641_s24  ;;  %v2181_v12 = vrot.slane %v4035_v30, %v3967_v6 }
 0x1ff   : > { %2066 = vrot.lane.b32.xlu0 %v3993_v14, %s3641_s24 }
 0x201   : > { %2346 = vrot.lane.b32.xlu1 %v4027_v26, %s3642_s26 }
 0x203   : > { %2208 = vrot.lane.b32.xlu0 %v2149_v11, %s3643_s29 }
 0x205   : > { %2461 = vrot.lane.b32.xlu1 %v4027_v26, %s3644_s30 }
 0x207   : > { %2224 = vrot.lane.b32.xlu0 %v2181_v12, %s3643_s29 }
 0x209   : > { %2576 = vrot.lane.b32.xlu1 %v4027_v26, %s3645_s5 }
 0x20b   : > { %2348 = vrot.lane.b32.xlu0 %v4045_v36, %s3642_s26 }
 0x20d   : > { %2691 = vrot.lane.b32.xlu1 %v4027_v26, %s3646_s6 }
 0x20f   : > { %2463 = vrot.lane.b32.xlu0 %v4045_v36, %s3644_s30 }
 0x211   : > { %2806 = vrot.lane.b32.xlu1 %v4027_v26, %s3647_s7 }
 0x213   : > { %2578 = vrot.lane.b32.xlu0 %v4045_v36, %s3645_s5 }
 0x215   : > { %2921 = vrot.lane.b32.xlu1 %v4027_v26, %s3648_s9 }
 0x217   : > { %2693 = vrot.lane.b32.xlu0 %v4045_v36, %s3646_s6 }
 0x219   : > { %1493 = vrot.lane.b32.xlu1 %v4016_v22, %s3630_s10 }
 0x21b   : > { %2808 = vrot.lane.b32.xlu0 %v4045_v36, %s3647_s7 }
 0x21d   : > { %1608 = vrot.lane.b32.xlu1 %v4016_v22, %s3633_s13 }
 0x21f   : > { %v3211_v14 = vpop.permute.xlu1 %3210  ;;  %2923 = vrot.lane.b32.xlu0 %v4045_v36, %s3648_s9 }
 0x220   : > { %3234 = vst.msk [vmem:[%s3933_s11 + $0xf] sm:$0x1] %vm1389_vm12, %v3211_v14 }
 0x221   : > { %v3213_v13 = vpop.permute.xlu0 %3212  ;;  %1723 = vrot.lane.b32.xlu1 %v4016_v22, %s3638_s14 }
 0x222   : > { %3235 = vst.msk [vmem:[%s3933_s11 + $0x1f] sm:$0x1] %vm1389_vm12, %v3213_v13 }
 0x223   : > { %v1482_v25 = vpop.permute.xlu1 %1481  ;;  %3073 = vrot.lane.b32.xlu0 %v3014_v15, %s3649_s8 }
 0x224   : > { %1505 = vst.msk [vmem:[%s3933_s11 + $0x1] sm:$0x1] %vm1389_vm12, %v1482_v25 }
 0x225   : > { %v1484_v26 = vpop.permute.xlu0 %1483  ;;  %1838 = vrot.lane.b32.xlu1 %v4016_v22, %s3639_s21 }
 0x226   : > { %1506 = vst.msk [vmem:[%s3933_s11 + $0x11] sm:$0x1] %vm1389_vm12, %v1484_v26 }
 0x227   : > { %v1597_v36 = vpop.permute.xlu1 %1596  ;;  %3089 = vrot.lane.b32.xlu0 %v3046_v27, %s3649_s8 }
 0x228   : > { %1620 = vst.msk [vmem:[%s3933_s11 + $0x2] sm:$0x1] %vm1389_vm12, %v1597_v36 }
 0x229   : > { %v1599_v11 = vpop.permute.xlu0 %1598  ;;  %1953 = vrot.lane.b32.xlu1 %v4016_v22, %s3640_s22 }
 0x22a   : > { %1621 = vst.msk [vmem:[%s3933_s11 + $0x12] sm:$0x1] %vm1389_vm12, %v1599_v11 }
 0x22b   : > { %v1712_v12 = vpop.permute.xlu1 %1711  ;;  %1495 = vrot.lane.b32.xlu0 %v4051_v39, %s3630_s10  ;;  %s3378_s10 = sshll.u32 %s3614_s18, 11  ;;  %s4846_s18 = sand.u32 1, %s3606_s16  }
 0x22c   : > { %1735 = vst.msk [vmem:[%s3933_s11 + $0x3] sm:$0x1] %vm1389_vm12, %v1712_v12 }
 0x22d   : > { %v1714_v14 = vpop.permute.xlu0 %1713  ;;  %2068 = vrot.lane.b32.xlu1 %v4016_v22, %s3641_s24 }
 0x22e   : > { %1736 = vst.msk [vmem:[%s3933_s11 + $0x13] sm:$0x1] %vm1389_vm12, %v1714_v14 }
 0x22f   : > { %v1827_v13 = vpop.permute.xlu1 %1826  ;;  %1610 = vrot.lane.b32.xlu0 %v4051_v39, %s3633_s13  ;;  %s3258_s13 = sshll.u32 %s3933_s11, 4  ;;  %s4784_s13 = int_to_ptr.vmem [resolvable:$true] %s3258_s13 }
 0x230   : > { %1850 = vst.msk [vmem:[%s3933_s11 + $0x4] sm:$0x1] %vm1389_vm12, %v1827_v13 }
 0x231   : > { %v1829_v15 = vpop.permute.xlu0 %1828  ;;  %2206 = vrot.lane.b32.xlu1 %v2145_v41, %s3643_s29 }
 0x232   : > { %1851 = vst.msk [vmem:[%s3933_s11 + $0x14] sm:$0x1] %vm1389_vm12, %v1829_v15 }
 0x233   : > { %v1942_v22 = vpop.permute.xlu1 %1941  ;;  %1725 = vrot.lane.b32.xlu0 %v4051_v39, %s3638_s14  ;;  %s4782_s14 = scalar_lea.hbm %s4841_s4, %s3378_s10 }
 0x234   : > { %1965 = vst.msk [vmem:[%s3933_s11 + $0x5] sm:$0x1] %vm1389_vm12, %v1942_v22 }
 0x235   : > { %v1944_v25 = vpop.permute.xlu0 %1943  ;;  %2222 = vrot.lane.b32.xlu1 %v2177_v42, %s3643_s29 }
 0x236   : > { %1966 = vst.msk [vmem:[%s3933_s11 + $0x15] sm:$0x1] %vm1389_vm12, %v1944_v25 }
 0x237   : > { %v2057_v28 = vpop.permute.xlu1 %2056  ;;  %1840 = vrot.lane.b32.xlu0 %v4051_v39, %s3639_s21  ;;  %s4792_s21 = scalar_lea.sflag [#allocation4], %s4846_s18 }
 0x238   : > { %2080 = vst.msk [vmem:[%s3933_s11 + $0x6] sm:$0x1] %vm1389_vm12, %v2057_v28 }
 0x239   : > { %v2059_v41 = vpop.permute.xlu0 %2058  ;;  %2350 = vrot.lane.b32.xlu1 %v4070_v48, %s3642_s26 }
 0x23a   : > { %2081 = vst.msk [vmem:[%s3933_s11 + $0x16] sm:$0x1] %vm1389_vm12, %v2059_v41 }
 0x23b   : > { %v3215_v26 = vpop.permute.xlu1 %3214  ;;  %1955 = vrot.lane.b32.xlu0 %v4051_v39, %s3640_s22  ;;  %s3546_s22 = scalar_lea.vmem %s4784_s13, 2048 }
 0x23c   : > { %3236 = vst.msk [vmem:[%s3933_s11 + $0x2f] sm:$0x1] %vm1389_vm12, %v3215_v26  ;;  %p3547_p12 = scmp.ne.s32.totalorder %s4784_s13, %s3546_s22 }
 0x23d   : > { %v3217_v30 = vpop.permute.xlu0 %3216  ;;  %2354 = vrot.lane.b32.xlu1 %v4099_v4, %s3642_s26 }
 0x23e   : > { %3237 = vst.msk [vmem:[%s3933_s11 + $0x3f] sm:$0x1] %vm1389_vm12, %v3217_v30  ;;  %p3548_p13 = pnand %p3547_p12, %p3718_p4 }
 0x23f   : > { %v3219_v42 = vpop.permute.xlu1 %3218  ;;  %2070 = vrot.lane.b32.xlu0 %v4051_v39, %s3641_s24  ;;  %s3650_s24 = smov [#allocation3]  }
 0x240   : > { %3238 = vst.msk [vmem:[%s3933_s11 + $0x4f] sm:$0x1] %vm1389_vm12, %v3219_v42  ;;  %p3549_p0 = pneg %p3548_p13 }
 0x241   : > { %2465 = vrot.lane.b32.xlu1 %v4070_v48, %s3644_s30  ;;  %v3221_v27 = vpop.permute.xlu0 %3220 }
 0x242   : > { %3239 = vst.msk [vmem:[%s3933_s11 + $0x5f] sm:$0x1] %vm1389_vm12, %v3221_v27 }
 0x243   : > { %v1486_v36 = vpop.permute.xlu1 %1485  ;;  %2212 = vrot.lane.b32.xlu0 %v2157_v55, %s3643_s29 }
 0x244   : > { %1507 = vst.msk [vmem:[%s3933_s11 + $0x21] sm:$0x1] %vm1389_vm12, %v1486_v36 }
 0x245   : > { %2469 = vrot.lane.b32.xlu1 %v4099_v4, %s3644_s30  ;;  %v1488_v39 = vpop.permute.xlu0 %1487 }
 0x246   : > { %1508 = vst.msk [vmem:[%s3933_s11 + $0x31] sm:$0x1] %vm1389_vm12, %v1488_v39 }
 0x247   : > { %v1490_v11 = vpop.permute.xlu1 %1489  ;;  %2216 = vrot.lane.b32.xlu0 %v2165_v57, %s3643_s29 }
 0x248   : > { %1509 = vst.msk [vmem:[%s3933_s11 + $0x41] sm:$0x1] %vm1389_vm12, %v1490_v11 }
 0x249   : > { %2580 = vrot.lane.b32.xlu1 %v4070_v48, %s3645_s5  ;;  %v1492_v55 = vpop.permute.xlu0 %1491 }
 0x24a   : > { %1510 = vst.msk [vmem:[%s3933_s11 + $0x51] sm:$0x1] %vm1389_vm12, %v1492_v55 }
 0x24b   : > { %v1601_v12 = vpop.permute.xlu1 %1600  ;;  %2228 = vrot.lane.b32.xlu0 %v2189_v63, %s3643_s29 }
 0x24c   : > { %1622 = vst.msk [vmem:[%s3933_s11 + $0x22] sm:$0x1] %vm1389_vm12, %v1601_v12 }
 0x24d   : > { %2584 = vrot.lane.b32.xlu1 %v4099_v4, %s3645_s5  ;;  %v1603_v57 = vpop.permute.xlu0 %1602 }
 0x24e   : > { %1623 = vst.msk [vmem:[%s3933_s11 + $0x32] sm:$0x1] %vm1389_vm12, %v1603_v57 }
 0x24f   : > { %v1605_v14 = vpop.permute.xlu1 %1604  ;;  %2232 = vrot.lane.b32.xlu0 %v2197_v0, %s3643_s29 }
 0x250   : > { %1624 = vst.msk [vmem:[%s3933_s11 + $0x42] sm:$0x1] %vm1389_vm12, %v1605_v14  ;;  %v4845_v14 = vrot.slane %v4162_v37, %v3949_v61 }
 0x251   : > { %2695 = vrot.lane.b32.xlu1 %v4070_v48, %s3646_s6  ;;  %v1607_v63 = vpop.permute.xlu0 %1606 }
 0x252   : > { %1625 = vst.msk [vmem:[%s3933_s11 + $0x52] sm:$0x1] %vm1389_vm12, %v1607_v63 }
 0x253   : > { %v1716_v13 = vpop.permute.xlu1 %1715  ;;  %2352 = vrot.lane.b32.xlu0 %v4096_v59, %s3642_s26 }
 0x254   : > { %1737 = vst.msk [vmem:[%s3933_s11 + $0x23] sm:$0x1] %vm1389_vm12, %v1716_v13 }
 0x255   : > { %2699 = vrot.lane.b32.xlu1 %v4099_v4, %s3646_s6  ;;  %v1718_v0 = vpop.permute.xlu0 %1717 }
 0x256   : > { %1738 = vst.msk [vmem:[%s3933_s11 + $0x33] sm:$0x1] %vm1389_vm12, %v1718_v0 }
 0x257   : > { %v1720_v15 = vpop.permute.xlu1 %1719  ;;  %2356 = vrot.lane.b32.xlu0 %v4130_v19, %s3642_s26 }
 0x258   : > { %1739 = vst.msk [vmem:[%s3933_s11 + $0x43] sm:$0x1] %vm1389_vm12, %v1720_v15 }
 0x259   : > { %2810 = vrot.lane.b32.xlu1 %v4070_v48, %s3647_s7  ;;  %v1722_v22 = vpop.permute.xlu0 %1721 }
 0x25a   : > { %1740 = vst.msk [vmem:[%s3933_s11 + $0x53] sm:$0x1] %vm1389_vm12, %v1722_v22 }
 0x25b   : > { %v1831_v25 = vpop.permute.xlu1 %1830  ;;  %2467 = vrot.lane.b32.xlu0 %v4096_v59, %s3644_s30 }
 0x25c   : > { %1852 = vst.msk [vmem:[%s3933_s11 + $0x24] sm:$0x1] %vm1389_vm12, %v1831_v25 }
 0x25d   : > { %2814 = vrot.lane.b32.xlu1 %v4099_v4, %s3647_s7  ;;  %v1833_v28 = vpop.permute.xlu0 %1832 }
 0x25e   : > { %1853 = vst.msk [vmem:[%s3933_s11 + $0x34] sm:$0x1] %vm1389_vm12, %v1833_v28 }
 0x25f   : > { %v1835_v41 = vpop.permute.xlu1 %1834  ;;  %2471 = vrot.lane.b32.xlu0 %v4130_v19, %s3644_s30 }
 0x260   : > { %1854 = vst.msk [vmem:[%s3933_s11 + $0x44] sm:$0x1] %vm1389_vm12, %v1835_v41 }
 0x261   : > { %v1837_v26 = vpop.permute.xlu0 %1836  ;;  %3071 = vrot.lane.b32.xlu1 %v3010_v56, %s3649_s8 }
 0x262   : > { %1855 = vst.msk [vmem:[%s3933_s11 + $0x54] sm:$0x1] %vm1389_vm12, %v1837_v26 }
 0x263   : > { %v1946_v30 = vpop.permute.xlu1 %1945  ;;  %2582 = vrot.lane.b32.xlu0 %v4096_v59, %s3645_s5 }
 0x264   : > { %1967 = vst.msk [vmem:[%s3933_s11 + $0x25] sm:$0x1] %vm1389_vm12, %v1946_v30 }
 0x265   : > { %v1948_v42 = vpop.permute.xlu0 %1947  ;;  %3087 = vrot.lane.b32.xlu1 %v3042_v62, %s3649_s8 }
 0x266   : > { %1968 = vst.msk [vmem:[%s3933_s11 + $0x35] sm:$0x1] %vm1389_vm12, %v1948_v42 }
 0x267   : > { %v1950_v43 = vpop.permute.xlu1 %1949  ;;  %2586 = vrot.lane.b32.xlu0 %v4130_v19, %s3645_s5 }
 0x268   : > { %1969 = vst.msk [vmem:[%s3933_s11 + $0x45] sm:$0x1] %vm1389_vm12, %v1950_v43 }
 0x269   : > { %v1952_v56 = vpop.permute.xlu0 %1951  ;;  %2925 = vrot.lane.b32.xlu1 %v4070_v48, %s3648_s9 }
 0x26a   : > { %1970 = vst.msk [vmem:[%s3933_s11 + $0x55] sm:$0x1] %vm1389_vm12, %v1952_v56 }
 0x26b   : > { %v2061_v27 = vpop.permute.xlu1 %2060  ;;  %2697 = vrot.lane.b32.xlu0 %v4096_v59, %s3646_s6 }
 0x26c   : > { %2082 = vst.msk [vmem:[%s3933_s11 + $0x26] sm:$0x1] %vm1389_vm12, %v2061_v27 }
 0x26d   : > { %v2063_v45 = vpop.permute.xlu0 %2062  ;;  %2929 = vrot.lane.b32.xlu1 %v4099_v4, %s3648_s9 }
 0x26e   : > { %2083 = vst.msk [vmem:[%s3933_s11 + $0x36] sm:$0x1] %vm1389_vm12, %v2063_v45 }
 0x26f   : > { %v2065_v62 = vpop.permute.xlu1 %2064  ;;  %2701 = vrot.lane.b32.xlu0 %v4130_v19, %s3646_s6 }
 0x270   : > { %2084 = vst.msk [vmem:[%s3933_s11 + $0x46] sm:$0x1] %vm1389_vm12, %v2065_v62 }
 0x271   : > { %v2067_v48 = vpop.permute.xlu0 %2066  ;;  %2210 = vrot.lane.b32.xlu1 %v2153_v58, %s3643_s29 }
 0x272   : > { %2085 = vst.msk [vmem:[%s3933_s11 + $0x56] sm:$0x1] %vm1389_vm12, %v2067_v48 }
 0x273   : > { %v2347_v36 = vpop.permute.xlu1 %2346  ;;  %2812 = vrot.lane.b32.xlu0 %v4096_v59, %s3647_s7 }
 0x274   : > { %2370 = vst.msk [vmem:[%s3933_s11 + $0x8] sm:$0x1] %vm1389_vm12, %v2347_v36 }
 0x275   : > { %v4489_v4 = vpop.permute.xlu0 %2208  ;;  %2214 = vrot.lane.b32.xlu1 %v2161_v1, %s3643_s29 }
 0x277   : > { %v2462_v39 = vpop.permute.xlu1 %2461  ;;  %2816 = vrot.lane.b32.xlu0 %v4130_v19, %s3647_s7 }
 0x278   : > { %2485 = vst.msk [vmem:[%s3933_s11 + $0x9] sm:$0x1] %vm1389_vm12, %v2462_v39 }
 0x279   : > { %v4499_v50 = vpop.permute.xlu0 %2224  ;;  %2226 = vrot.lane.b32.xlu1 %v2185_v10, %s3643_s29 }
 0x27b   : > { %v2577_v58 = vpop.permute.xlu1 %2576  ;;  %3077 = vrot.lane.b32.xlu0 %v3022_v29, %s3649_s8 }
 0x27c   : > { %2600 = vst.msk [vmem:[%s3933_s11 + $0xa] sm:$0x1] %vm1389_vm12, %v2577_v58 }
 0x27d   : > { %v2349_v51 = vpop.permute.xlu0 %2348  ;;  %2230 = vrot.lane.b32.xlu1 %v2193_v60, %s3643_s29 }
 0x27e   : > { %2371 = vst.msk [vmem:[%s3933_s11 + $0x18] sm:$0x1] %vm1389_vm12, %v2349_v51 }
 0x27f   : > { %v2692_v53 = vpop.permute.xlu1 %2691  ;;  %3081 = vrot.lane.b32.xlu0 %v3030_v31, %s3649_s8 }
 0x280   : > { %2715 = vst.msk [vmem:[%s3933_s11 + $0xb] sm:$0x1] %vm1389_vm12, %v2692_v53 }
 0x281   : > { %v2464_v1 = vpop.permute.xlu0 %2463  ;;  %2358 = vrot.lane.b32.xlu1 %v4150_v34, %s3642_s26 }
 0x282   : > { %2486 = vst.msk [vmem:[%s3933_s11 + $0x19] sm:$0x1] %vm1389_vm12, %v2464_v1 }
 0x283   : > { %v2807_v54 = vpop.permute.xlu1 %2806  ;;  %3093 = vrot.lane.b32.xlu0 %v3054_v33, %s3649_s8 }
 0x284   : > { %2830 = vst.msk [vmem:[%s3933_s11 + $0xc] sm:$0x1] %vm1389_vm12, %v2807_v54 }
 0x285   : > { %v2579_v10 = vpop.permute.xlu0 %2578  ;;  %2473 = vrot.lane.b32.xlu1 %v4150_v34, %s3644_s30 }
 0x286   : > { %2601 = vst.msk [vmem:[%s3933_s11 + $0x1a] sm:$0x1] %vm1389_vm12, %v2579_v10 }
 0x287   : > { %v2922_v60 = vpop.permute.xlu1 %2921  ;;  %3097 = vrot.lane.b32.xlu0 %v3062_v35, %s3649_s8 }
 0x288   : > { %2945 = vst.msk [vmem:[%s3933_s11 + $0xd] sm:$0x1] %vm1389_vm12, %v2922_v60 }
 0x289   : > { %v2694_v29 = vpop.permute.xlu0 %2693  ;;  %2588 = vrot.lane.b32.xlu1 %v4150_v34, %s3645_s5 }
 0x28a   : > { %2716 = vst.msk [vmem:[%s3933_s11 + $0x1b] sm:$0x1] %vm1389_vm12, %v2694_v29 }
 0x28b   : > { %v1494_v31 = vpop.permute.xlu1 %1493  ;;  %2927 = vrot.lane.b32.xlu0 %v4096_v59, %s3648_s9 }
 0x28c   : > { %1511 = vst.msk [vmem:[%s3933_s11 + $0x61] sm:$0x1] %vm1389_vm12, %v1494_v31 }
 0x28d   : > { %v2809_v33 = vpop.permute.xlu0 %2808  ;;  %2703 = vrot.lane.b32.xlu1 %v4150_v34, %s3646_s6 }
 0x28e   : > { %2831 = vst.msk [vmem:[%s3933_s11 + $0x1c] sm:$0x1] %vm1389_vm12, %v2809_v33 }
 0x28f   : > { %v1609_v35 = vpop.permute.xlu1 %1608  ;;  %2931 = vrot.lane.b32.xlu0 %v4130_v19, %s3648_s9 }
 0x290   : > { %1626 = vst.msk [vmem:[%s3933_s11 + $0x62] sm:$0x1] %vm1389_vm12, %v1609_v35 }
 0x291   : > { %v2924_v11 = vpop.permute.xlu0 %2923  ;;  %2818 = vrot.lane.b32.xlu1 %v4150_v34, %s3647_s7 }
 0x292   : > { %2946 = vst.msk [vmem:[%s3933_s11 + $0x1d] sm:$0x1] %vm1389_vm12, %v2924_v11 }
 0x293   : > { %v1724_v59 = vpop.permute.xlu1 %1723  ;;  %2220 = vrot.lane.b32.xlu0 %v2173_v16, %s3643_s29 }
 0x294   : > { %1741 = vst.msk [vmem:[%s3933_s11 + $0x63] sm:$0x1] %vm1389_vm12, %v1724_v59 }
 0x295   : > { %v4569_v19 = vpop.permute.xlu0 %3073  ;;  %3075 = vrot.lane.b32.xlu1 %v3018_v32, %s3649_s8 }
 0x297   : > { %v1839_v55 = vpop.permute.xlu1 %1838  ;;  %2236 = vrot.lane.b32.xlu0 %v2205_v47, %s3643_s29 }
 0x298   : > { %1856 = vst.msk [vmem:[%s3933_s11 + $0x64] sm:$0x1] %vm1389_vm12, %v1839_v55 }
 0x299   : > { %v4581_v16 = vpop.permute.xlu0 %3089  ;;  %3079 = vrot.lane.b32.xlu1 %v3026_v38, %s3649_s8 }
 0x29b   : > { %v1954_v12 = vpop.permute.xlu1 %1953  ;;  %2360 = vrot.lane.b32.xlu0 %v4187_v7, %s3642_s26  ;;  %s3550_s26 = sshll.u32 %s3650_s24, 4  ;;  %s3551_s26 = int_to_ptr.vmem [resolvable:$false] %s3550_s26 }
 0x29c   : > { %1971 = vst.msk [vmem:[%s3933_s11 + $0x65] sm:$0x1] %vm1389_vm12, %v1954_v12  ;;  %p3553_p1 = scmp.lt.s32.totalorder %s4784_s13, %s3551_s26 }
 0x29d   : > { %v1496_v8 = vpop.permute.xlu0 %1495  ;;  %3091 = vrot.lane.b32.xlu1 %v3050_v44, %s3649_s8 }
 0x29e   : > { %1512 = vst.msk [vmem:[%s3933_s11 + $0x71] sm:$0x1] %vm1389_vm12, %v1496_v8 }
 0x29f   : > { %v2069_v32 = vpop.permute.xlu1 %2068  ;;  %2475 = vrot.lane.b32.xlu0 %v4187_v7, %s3644_s30 }
 0x2a0   : > { %2086 = vst.msk [vmem:[%s3933_s11 + $0x66] sm:$0x1] %vm1389_vm12, %v2069_v32 }
 0x2a1   : > { %v1611_v2 = vpop.permute.xlu0 %1610  ;;  %3095 = vrot.lane.b32.xlu1 %v3058_v46, %s3649_s8 }
 0x2a2   : > { %1627 = vst.msk [vmem:[%s3933_s11 + $0x72] sm:$0x1] %vm1389_vm12, %v1611_v2 }
 0x2a3   : > { %v2207_v20 = vpop.permute.xlu1 %2206  ;;  %2590 = vrot.lane.b32.xlu0 %v4187_v7, %s3645_s5 }
 0x2a4   : > { %v2239_v38 = vsel %vm2238_vm13, %v2207_v20, %v4489_v4 }
 0x2a5   : > { %2255 = vst.msk [vmem:[%s3933_s11 + $0x7] sm:$0x1] %vm1389_vm12, %v2239_v38  ;;  %v1726_v44 = vpop.permute.xlu0 %1725  ;;  %2933 = vrot.lane.b32.xlu1 %v4150_v34, %s3648_s9 }
 0x2a6   : > { %1742 = vst.msk [vmem:[%s3933_s11 + $0x73] sm:$0x1] %vm1389_vm12, %v1726_v44 }
 0x2a7   : > { %v2223_v9 = vpop.permute.xlu1 %2222  ;;  %2705 = vrot.lane.b32.xlu0 %v4187_v7, %s3646_s6 }
 0x2a8   : > { %v2243_v46 = vsel %vm2238_vm13, %v2223_v9, %v4499_v50 }
 0x2a9   : > { %2259 = vst.msk [vmem:[%s3933_s11 + $0x47] sm:$0x1] %vm1389_vm12, %v2243_v46  ;;  %v1841_v47 = vpop.permute.xlu0 %1840  ;;  %2218 = vrot.lane.b32.xlu1 %v2169_v49, %s3643_s29 }
 0x2aa   : > { %1857 = vst.msk [vmem:[%s3933_s11 + $0x74] sm:$0x1] %vm1389_vm12, %v1841_v47 }
 0x2ab   : > { %v2351_v34 = vpop.permute.xlu1 %2350  ;;  %2820 = vrot.lane.b32.xlu0 %v4187_v7, %s3647_s7 }
 0x2ac   : > { %2372 = vst.msk [vmem:[%s3933_s11 + $0x28] sm:$0x1] %vm1389_vm12, %v2351_v34 }
 0x2ad   : > { %v1956_v57 = vpop.permute.xlu0 %1955  ;;  %2234 = vrot.lane.b32.xlu1 %v4845_v14, %s3643_s29  ;;  %s3552_s29 = scalar_lea.vmem %s3551_s26, 4096 }
 0x2ae   : > { %1972 = vst.msk [vmem:[%s3933_s11 + $0x75] sm:$0x1] %vm1389_vm12, %v1956_v57  ;;  %p3554_p2 = scmp.lt.s32.totalorder %s3552_s29, %s3546_s22 }
 0x2af   : > { %v2355_v21 = vpop.permute.xlu1 %2354  ;;  %3085 = vrot.lane.b32.xlu0 %v3038_v23, %s3649_s8 }
 0x2b0   : > { %2374 = vst.msk [vmem:[%s3933_s11 + $0x48] sm:$0x1] %vm1389_vm12, %v2355_v21  ;;  %p3555_p3 = por %p3554_p2, %p3553_p1 }
 0x2b1   : > { %v2071_v49 = vpop.permute.xlu0 %2070  ;;  %3083 = vrot.lane.b32.xlu1 %v3034_v40, %s3649_s8 }
 0x2b2   : > { %2087 = vst.msk [vmem:[%s3933_s11 + $0x76] sm:$0x1] %vm1389_vm12, %v2071_v49  ;;  %p3556_p5 = pnand %p3555_p3, %p3549_p0 }
 0x2b3   : > { %v2466_v37 = vpop.permute.xlu1 %2465  ;;  %3101 = vrot.lane.b32.xlu0 %v3070_v3, %s3649_s8 }
 0x2b4   : > { %2487 = vst.msk [vmem:[%s3933_s11 + $0x29] sm:$0x1] %vm1389_vm12, %v2466_v37 }
 0x2b5   : > { %v2213_v23 = vpop.permute.xlu0 %2212  ;;  %3099 = vrot.lane.b32.xlu1 %v3066_v24, %s3649_s8 }
 0x2b7   : > { %v2470_v17 = vpop.permute.xlu1 %2469  ;;  %2935 = vrot.lane.b32.xlu0 %v4187_v7, %s3648_s9 }
 0x2b8   : > { %2489 = vst.msk [vmem:[%s3933_s11 + $0x49] sm:$0x1] %vm1389_vm12, %v2470_v17 }
 0x2b9   : > { %v2217_v40 = vpop.permute.xlu0 %2216  ;;  %3222 = vrot.lane.b32.xlu1 %v4197_v18, %s3637_s12 }
 0x2bb   : > { %v2581_v6 = vpop.permute.xlu1 %2580  ;;  %3224 = vrot.lane.b32.xlu0 %v4203_v52, %s3637_s12 }
 0x2bc   : > { %2602 = vst.msk [vmem:[%s3933_s11 + $0x2a] sm:$0x1] %vm1389_vm12, %v2581_v6 }
 0x2bd   : > { %v2229_v61 = vpop.permute.xlu0 %2228 }
 0x2bf   : > { %v2585_v5 = vpop.permute.xlu1 %2584 }
 0x2c0   : > { %2604 = vst.msk [vmem:[%s3933_s11 + $0x4a] sm:$0x1] %vm1389_vm12, %v2585_v5 }
 0x2c1   : > { %v2233_v7 = vpop.permute.xlu0 %2232 }
 0x2c3   : > { %v2696_v3 = vpop.permute.xlu1 %2695 }
 0x2c4   : > { %2717 = vst.msk [vmem:[%s3933_s11 + $0x2b] sm:$0x1] %vm1389_vm12, %v2696_v3 }
 0x2c5   : > { %v2353_v24 = vpop.permute.xlu0 %2352 }
 0x2c6   : > { %2373 = vst.msk [vmem:[%s3933_s11 + $0x38] sm:$0x1] %vm1389_vm12, %v2353_v24 }
 0x2c7   : > { %v2700_v18 = vpop.permute.xlu1 %2699 }
 0x2c8   : > { %2719 = vst.msk [vmem:[%s3933_s11 + $0x4b] sm:$0x1] %vm1389_vm12, %v2700_v18 }
 0x2c9   : > { %v2357_v52 = vpop.permute.xlu0 %2356 }
 0x2ca   : > { %2375 = vst.msk [vmem:[%s3933_s11 + $0x58] sm:$0x1] %vm1389_vm12, %v2357_v52 }
 0x2cb   : > { %v2811_v63 = vpop.permute.xlu1 %2810 }
 0x2cc   : > { %2832 = vst.msk [vmem:[%s3933_s11 + $0x2c] sm:$0x1] %vm1389_vm12, %v2811_v63 }
 0x2cd   : > { %v2468_v13 = vpop.permute.xlu0 %2467 }
 0x2ce   : > { %2488 = vst.msk [vmem:[%s3933_s11 + $0x39] sm:$0x1] %vm1389_vm12, %v2468_v13 }
 0x2cf   : > { %v2815_v0 = vpop.permute.xlu1 %2814 }
 0x2d0   : > { %2834 = vst.msk [vmem:[%s3933_s11 + $0x4c] sm:$0x1] %vm1389_vm12, %v2815_v0 }
 0x2d1   : > { %v2472_v15 = vpop.permute.xlu0 %2471 }
 0x2d2   : > { %2490 = vst.msk [vmem:[%s3933_s11 + $0x59] sm:$0x1] %vm1389_vm12, %v2472_v15 }
 0x2d3   : > { %v3072_v22 = vpop.permute.xlu1 %3071 }
 0x2d4   : > { %v3103_v25 = vsel %vm242_vm3, %v3072_v22, %v4569_v19 }
 0x2d5   : > { %3119 = vst.msk [vmem:[%s3933_s11 + $0xe] sm:$0x1] %vm1389_vm12, %v3103_v25  ;;  %v2583_v28 = vpop.permute.xlu0 %2582 }
 0x2d6   : > { %2603 = vst.msk [vmem:[%s3933_s11 + $0x3a] sm:$0x1] %vm1389_vm12, %v2583_v28 }
 0x2d7   : > { %v3088_v41 = vpop.permute.xlu1 %3087 }
 0x2d8   : > { %v3107_v26 = vsel %vm242_vm3, %v3088_v41, %v4581_v16 }
 0x2d9   : > { %3123 = vst.msk [vmem:[%s3933_s11 + $0x4e] sm:$0x1] %vm1389_vm12, %v3107_v26  ;;  %v2587_v30 = vpop.permute.xlu0 %2586 }
 0x2da   : > { %2605 = vst.msk [vmem:[%s3933_s11 + $0x5a] sm:$0x1] %vm1389_vm12, %v2587_v30 }
 0x2db   : > { %v2926_v42 = vpop.permute.xlu1 %2925 }
 0x2dc   : > { %2947 = vst.msk [vmem:[%s3933_s11 + $0x2d] sm:$0x1] %vm1389_vm12, %v2926_v42 }
 0x2dd   : > { %v2698_v43 = vpop.permute.xlu0 %2697 }
 0x2de   : > { %2718 = vst.msk [vmem:[%s3933_s11 + $0x3b] sm:$0x1] %vm1389_vm12, %v2698_v43 }
 0x2df   : > { %v2930_v56 = vpop.permute.xlu1 %2929 }
 0x2e0   : > { %2949 = vst.msk [vmem:[%s3933_s11 + $0x4d] sm:$0x1] %vm1389_vm12, %v2930_v56 }
 0x2e1   : > { %v2702_v27 = vpop.permute.xlu0 %2701 }
 0x2e2   : > { %2720 = vst.msk [vmem:[%s3933_s11 + $0x5b] sm:$0x1] %vm1389_vm12, %v2702_v27 }
 0x2e3   : > { %v2211_v45 = vpop.permute.xlu1 %2210 }
 0x2e4   : > { %v2240_v62 = vsel %vm2238_vm13, %v2211_v45, %v2213_v23 }
 0x2e5   : > { %2256 = vst.msk [vmem:[%s3933_s11 + $0x17] sm:$0x1] %vm1389_vm12, %v2240_v62  ;;  %v2813_v48 = vpop.permute.xlu0 %2812 }
 0x2e6   : > { %2833 = vst.msk [vmem:[%s3933_s11 + $0x3c] sm:$0x1] %vm1389_vm12, %v2813_v48 }
 0x2e7   : > { %v2215_v36 = vpop.permute.xlu1 %2214 }
 0x2e8   : > { %v2241_v4 = vsel %vm2238_vm13, %v2215_v36, %v2217_v40 }
 0x2e9   : > { %2257 = vst.msk [vmem:[%s3933_s11 + $0x27] sm:$0x1] %vm1389_vm12, %v2241_v4  ;;  %v2817_v39 = vpop.permute.xlu0 %2816 }
 0x2ea   : > { %2835 = vst.msk [vmem:[%s3933_s11 + $0x5c] sm:$0x1] %vm1389_vm12, %v2817_v39 }
 0x2eb   : > { %v2227_v50 = vpop.permute.xlu1 %2226 }
 0x2ec   : > { %v2244_v58 = vsel %vm2238_vm13, %v2227_v50, %v2229_v61 }
 0x2ed   : > { %2260 = vst.msk [vmem:[%s3933_s11 + $0x57] sm:$0x1] %vm1389_vm12, %v2244_v58  ;;  %v3078_v51 = vpop.permute.xlu0 %3077 }
 0x2ef   : > { %v2231_v53 = vpop.permute.xlu1 %2230 }
 0x2f0   : > { %v2245_v1 = vsel %vm2238_vm13, %v2231_v53, %v2233_v7 }
 0x2f1   : > { %2261 = vst.msk [vmem:[%s3933_s11 + $0x67] sm:$0x1] %vm1389_vm12, %v2245_v1  ;;  %v3082_v54 = vpop.permute.xlu0 %3081 }
 0x2f3   : > { %v2359_v10 = vpop.permute.xlu1 %2358 }
 0x2f4   : > { %2376 = vst.msk [vmem:[%s3933_s11 + $0x68] sm:$0x1] %vm1389_vm12, %v2359_v10 }
 0x2f5   : > { %v3094_v60 = vpop.permute.xlu0 %3093 }
 0x2f7   : > { %v2474_v29 = vpop.permute.xlu1 %2473 }
 0x2f8   : > { %2491 = vst.msk [vmem:[%s3933_s11 + $0x69] sm:$0x1] %vm1389_vm12, %v2474_v29 }
 0x2f9   : > { %v3098_v31 = vpop.permute.xlu0 %3097 }
 0x2fb   : > { %v2589_v33 = vpop.permute.xlu1 %2588 }
 0x2fc   : > { %2606 = vst.msk [vmem:[%s3933_s11 + $0x6a] sm:$0x1] %vm1389_vm12, %v2589_v33 }
 0x2fd   : > { %v2928_v35 = vpop.permute.xlu0 %2927 }
 0x2fe   : > { %2948 = vst.msk [vmem:[%s3933_s11 + $0x3d] sm:$0x1] %vm1389_vm12, %v2928_v35 }
 0x2ff   : > { %v2704_v11 = vpop.permute.xlu1 %2703 }
 0x300   : > { %2721 = vst.msk [vmem:[%s3933_s11 + $0x6b] sm:$0x1] %vm1389_vm12, %v2704_v11 }
 0x301   : > { %v2932_v59 = vpop.permute.xlu0 %2931 }
 0x302   : > { %2950 = vst.msk [vmem:[%s3933_s11 + $0x5d] sm:$0x1] %vm1389_vm12, %v2932_v59 }
 0x303   : > { %v2819_v19 = vpop.permute.xlu1 %2818 }
 0x304   : > { %2836 = vst.msk [vmem:[%s3933_s11 + $0x6c] sm:$0x1] %vm1389_vm12, %v2819_v19 }
 0x305   : > { %v2221_v55 = vpop.permute.xlu0 %2220 }
 0x307   : > { %v3076_v16 = vpop.permute.xlu1 %3075 }
 0x308   : > { %v3104_v12 = vsel %vm242_vm3, %v3076_v16, %v3078_v51 }
 0x309   : > { %3120 = vst.msk [vmem:[%s3933_s11 + $0x1e] sm:$0x1] %vm1389_vm12, %v3104_v12  ;;  %v2237_v8 = vpop.permute.xlu0 %2236 }
 0x30b   : > { %v3080_v32 = vpop.permute.xlu1 %3079 }
 0x30c   : > { %v3105_v2 = vsel %vm242_vm3, %v3080_v32, %v3082_v54 }
 0x30d   : > { %3121 = vst.msk [vmem:[%s3933_s11 + $0x2e] sm:$0x1] %vm1389_vm12, %v3105_v2  ;;  %v2361_v20 = vpop.permute.xlu0 %2360 }
 0x30e   : > { %2377 = vst.msk [vmem:[%s3933_s11 + $0x78] sm:$0x1] %vm1389_vm12, %v2361_v20 }
 0x30f   : > { %v3092_v38 = vpop.permute.xlu1 %3091 }
 0x310   : > { %v3108_v44 = vsel %vm242_vm3, %v3092_v38, %v3094_v60 }
 0x311   : > { %3124 = vst.msk [vmem:[%s3933_s11 + $0x5e] sm:$0x1] %vm1389_vm12, %v3108_v44  ;;  %v2476_v9 = vpop.permute.xlu0 %2475 }
 0x312   : > { %2492 = vst.msk [vmem:[%s3933_s11 + $0x79] sm:$0x1] %vm1389_vm12, %v2476_v9 }
 0x313   : > { %v3096_v46 = vpop.permute.xlu1 %3095 }
 0x314   : > { %v3109_v47 = vsel %vm242_vm3, %v3096_v46, %v3098_v31 }
 0x315   : > { %3125 = vst.msk [vmem:[%s3933_s11 + $0x6e] sm:$0x1] %vm1389_vm12, %v3109_v47  ;;  %v2591_v34 = vpop.permute.xlu0 %2590 }
 0x316   : > { %2607 = vst.msk [vmem:[%s3933_s11 + $0x7a] sm:$0x1] %vm1389_vm12, %v2591_v34 }
 0x317   : > { %v2934_v57 = vpop.permute.xlu1 %2933 }
 0x318   : > { %2951 = vst.msk [vmem:[%s3933_s11 + $0x6d] sm:$0x1] %vm1389_vm12, %v2934_v57 }
 0x319   : > { %v2706_v14 = vpop.permute.xlu0 %2705 }
 0x31a   : > { %2722 = vst.msk [vmem:[%s3933_s11 + $0x7b] sm:$0x1] %vm1389_vm12, %v2706_v14 }
 0x31b   : > { %v2219_v21 = vpop.permute.xlu1 %2218 }
 0x31c   : > { %v2242_v49 = vsel %vm2238_vm13, %v2219_v21, %v2221_v55 }
 0x31d   : > { %2258 = vst.msk [vmem:[%s3933_s11 + $0x37] sm:$0x1] %vm1389_vm12, %v2242_v49  ;;  %v2821_v37 = vpop.permute.xlu0 %2820 }
 0x31e   : > { %2837 = vst.msk [vmem:[%s3933_s11 + $0x7c] sm:$0x1] %vm1389_vm12, %v2821_v37 }
 0x31f   : > { %v2235_v23 = vpop.permute.xlu1 %2234 }
 0x320   : > { %v2246_v17 = vsel %vm2238_vm13, %v2235_v23, %v2237_v8 }
 0x321   : > { %2262 = vst.msk [vmem:[%s3933_s11 + $0x77] sm:$0x1] %vm1389_vm12, %v2246_v17  ;;  %v3086_v40 = vpop.permute.xlu0 %3085 }
 0x323   : > { %v3084_v6 = vpop.permute.xlu1 %3083 }
 0x324   : > { %v3106_v61 = vsel %vm242_vm3, %v3084_v6, %v3086_v40 }
 0x325   : > { %3122 = vst.msk [vmem:[%s3933_s11 + $0x3e] sm:$0x1] %vm1389_vm12, %v3106_v61  ;;  %v3102_v5 = vpop.permute.xlu0 %3101 }
 0x327   : > { %v3100_v7 = vpop.permute.xlu1 %3099 }
 0x328   : > { %v3110_v3 = vsel %vm242_vm3, %v3100_v7, %v3102_v5 }
 0x329   : > { %3126 = vst.msk [vmem:[%s3933_s11 + $0x7e] sm:$0x1] %vm1389_vm12, %v3110_v3  ;;  %v2936_v24 = vpop.permute.xlu0 %2935 }
 0x32a   : > { %2952 = vst.msk [vmem:[%s3933_s11 + $0x7d] sm:$0x1] %vm1389_vm12, %v2936_v24 }
 0x32b   : > { %v3223_v18 = vpop.permute.xlu1 %3222 }
 0x32c   : > { %3240 = vst.msk [vmem:[%s3933_s11 + $0x6f] sm:$0x1] %vm1389_vm12, %v3223_v18 }
 0x32d   : > { %v3225_v52 = vpop.permute.xlu0 %3224 }
 0x32e   : > { %3241 = vst.msk [vmem:[%s3933_s11 + $0x7f] sm:$0x1] %vm1389_vm12, %v3225_v52 }
 0x32f   : > { %3559 = shalt.err (!%p3556_p5)
}
 0x330   : > { %s3560_s11 = scalar_lea.hbm %s4782_s14, 2048  ;;  %s3564_s6 = scalar_lea.hbm %s4841_s4, 4096 }
 0x331   : > { %p3561_p6 = scmp.ne.s32.totalorder %s4782_s14, %s3560_s11  ;;  %p3565_p10 = scmp.lt.s32.totalorder %s4782_s14, %s4841_s4 }
 0x332   : > { %p3566_p11 = scmp.lt.s32.totalorder %s3564_s6, %s3560_s11 }
 0x333   : > { %p3562_p7 = pnand %p3561_p6, %p3718_p4 }
 0x334   : > { %p3567_p12 = por %p3566_p11, %p3565_p10 }
 0x335   : > { %p3563_p9 = pneg %p3562_p7 }
 0x337   : > { %p3568_p13 = pnand %p3567_p12, %p3563_p9 }
 0x339   : > { %3571 = shalt.err (!%p3568_p13)
}
 0x33a   : > { %s3651_s10 = smov 128   ;;  %s3652_s8 = smov 8  }
 0x33b   : > { %3452 = dma.vmem_to_hbm [thread:$0]  (%p3718_p4), %s4784_s13, 2048, %s4782_s14, %s4792_s21, %s3651_s10, %s3651_s10, %s3652_s8  }
 0x33c PF: > { %p3458_p0 = scmp.ge.s32.totalorder %s3622_s20, 2  ;;  %s3273_s12 = sand.u32 1, %s3602_s15  }
 0x33d   : > { %s3274_s18 = scalar_lea.sflag [#allocation4], %s3273_s12 }
 0x33e   : > { %p3455_p1 = pnand %p3458_p0, %p3725_p8 }
 0x340   : > { %p3456_p2 = pneg %p3455_p1 }
 0x342   : > { %3597 = dma.done.wait (%p3456_p2), %s3274_s18, 2048  }
 0x343   : > { %3599 = vsyncadd (%p3456_p2), %s3274_s18, 4294965248  ;;  %s17_s20 = sadd.s32 1, %s3622_s20   ;;  %s4847_s15 = smov %s3606_s16 }
 0x344   : > { %p14_p3 = scmp.ge.s32.totalorder %s17_s20, 4   ;;  %s4848_s16 = smov %s3610_s17 }
 0x345   : > { %s4849_s17 = smov %s3731_s28  ;;  %s4850_s18 = smov %s3618_s19 }
 0x346   : > { %s4851_s19 = smov %s4853_s23  ;;  %16 = sbr.rel (!%p14_p3) target bundleno = 4 (0x4), region = 79 }
 0x34b   :  { %3279 = vsyncpa [#allocation4], 1 }
 0x34c   :  { %3281 = vsyncpa [#allocation4 + $0x1], 1 }

</bundles_post_ra>
